<compile_context>
chip_gen: v5e
topology: v5e:2x2
jax: 0.10.0
libtpu: 0.0.40
codegen_flags: <defaults>
</compile_context>

<pallas_src>
import jax
import jax.numpy as jnp
from jax.experimental import pallas as pl
from jax.experimental.pallas import tpu as pltpu

LATENT_DIM, HIDDEN_DIM, OUTPUT_DIM = 256, 512, 1024


def _round_up(n, m):
    return (n + m - 1) // m * m


def _choose_tile_m(B, max_tile=512):
    """Row tile: single tile for small B; otherwise a 128-multiple tile that minimizes
    padding and yields >= 2 grid steps (keeps both v7x TensorCores busy)."""
    if B <= 128:
        return max(8, _round_up(B, 8))
    best_t, best_key = None, None
    for t in (128, 256, 512, 1024):
        if t > max_tile:
            break
        steps = -(-B // t)
        if steps < 2:               # keep >= 2 grid steps for megacore sharding
            continue
        pad = steps * t - B
        key = (pad, -t)             # least padding first, then largest tile
        if best_key is None or key < best_key:
            best_t, best_key = t, key
    return 128 if best_t is None else best_t


def decoder_kernel(x_ref, w1_ref, b1_ref, w2_ref, b2_ref, o_ref):
    # x_ref: (TM, latent) f32, w1_ref: (latent, hidden) bf16, b1_ref: (1, hidden) f32
    # w2_ref: (hidden, output) bf16, b2_ref: (1, output) f32, o_ref: (TM, output) out_dtype
    x = x_ref[...].astype(jnp.bfloat16)                         # in-kernel cast for the MXU
    h = jnp.dot(x, w1_ref[...], preferred_element_type=jnp.float32)
    h = jnp.maximum(h + b1_ref[...], 0.0)                       # bias + ReLU in f32 (VPU)
    y = jnp.dot(h.astype(jnp.bfloat16), w2_ref[...],
                preferred_element_type=jnp.float32)
    y = y + b2_ref[...]
    # sigmoid(y) = 1 / (1 + exp(-y)); exp + approx reciprocal both use the EUP slot.
    s = pl.reciprocal(1.0 + jnp.exp(-y), approx=True)
    o_ref[...] = s.astype(o_ref.dtype)


def prepare_decoder_params(w1, b1, w2, b2):
    """One-time (per init) parameter prep: bf16 MXU weights, f32 2-D biases."""
    return (w1.astype(jnp.bfloat16),
            b1.reshape(1, -1).astype(jnp.float32),
            w2.astype(jnp.bfloat16),
            b2.reshape(1, -1).astype(jnp.float32))


def decoder_forward(x, params, *, out_dtype=None, max_tile_m=512):
    w1_bf, b1_2d, w2_bf, b2_2d = params
    B, latent_dim = x.shape
    hidden_dim = w1_bf.shape[1]
    output_dim = w2_bf.shape[1]
    out_dtype = x.dtype if out_dtype is None else out_dtype

    tile_m = _choose_tile_m(B, max_tile_m)
    grid = (pl.cdiv(B, tile_m),)

    out_bytes = B * output_dim * jnp.dtype(out_dtype).itemsize
    cost = pl.CostEstimate(
        flops=2 * B * (latent_dim * hidden_dim + hidden_dim * output_dim),
        transcendentals=2 * B * output_dim,                      # exp + reciprocal
        bytes_accessed=(4 * x.size + 2 * w1_bf.size + 2 * w2_bf.size
                        + 4 * b1_2d.size + 4 * b2_2d.size + out_bytes),
    )

    return pl.pallas_call(
        decoder_kernel,
        out_shape=jax.ShapeDtypeStruct((B, output_dim), out_dtype),
        grid_spec=pltpu.PrefetchScalarGridSpec(
            num_scalar_prefetch=0,
            grid=grid,
            in_specs=[
                pl.BlockSpec((tile_m, latent_dim), lambda i: (i, 0)),       # x row tile (f32)
                pl.BlockSpec((latent_dim, hidden_dim), lambda i: (0, 0)),   # W1 (VMEM-resident)
                pl.BlockSpec((1, hidden_dim), lambda i: (0, 0)),            # b1
                pl.BlockSpec((hidden_dim, output_dim), lambda i: (0, 0)),   # W2 (VMEM-resident)
                pl.BlockSpec((1, output_dim), lambda i: (0, 0)),            # b2
            ],
            out_specs=pl.BlockSpec((tile_m, output_dim), lambda i: (i, 0)),
        ),
        compiler_params=pltpu.CompilerParams(
            dimension_semantics=("parallel",),        # row tiles shard across TCs on v7x
            vmem_limit_bytes=32 * 1024 * 1024,        # headroom if max_tile_m is raised
        ),
        cost_estimate=cost,
    )(x, w1_bf, b1_2d, w2_bf, b2_2d)


def reference_forward(x, w1, b1, w2, b2):
    h = jnp.maximum(x @ w1 + b1, 0.0)
    return jax.nn.sigmoid(h @ w2 + b2)


if __name__ == "__main__":
    key = jax.random.PRNGKey(0)
    k_x, k_w1, k_b1, k_w2, k_b2 = jax.random.split(key, 5)

    # Deterministic synthetic parameters (PyTorch-like uniform fan-in init).
    lim1 = 1.0 / (LATENT_DIM ** 0.5)
    lim2 = 1.0 / (HIDDEN_DIM ** 0.5)
    w1 = jax.random.uniform(k_w1, (LATENT_DIM, HIDDEN_DIM), jnp.float32, -lim1, lim1)
    b1 = jax.random.uniform(k_b1, (HIDDEN_DIM,), jnp.float32, -lim1, lim1)
    w2 = jax.random.uniform(k_w2, (HIDDEN_DIM, OUTPUT_DIM), jnp.float32, -lim2, lim2)
    b2 = jax.random.uniform(k_b2, (OUTPUT_DIM,), jnp.float32, -lim2, lim2)

    params = prepare_decoder_params(w1, b1, w2, b2)   # hoisted one-time bf16 cast

    # Small batch (single tile), non-8/128-aligned batch (partial-block path),
    # and a batch that exercises multiple parallel grid steps with zero padding.
    for batch in (8, 100, 384):
        x = jax.random.normal(jax.random.fold_in(k_x, batch), (batch, LATENT_DIM), jnp.float32)

        out = jax.block_until_ready(decoder_forward(x, params))
        ref = reference_forward(x, w1, b1, w2, b2)
        assert out.shape == (batch, OUTPUT_DIM), out.shape
        assert out.dtype == jnp.float32
        # bf16 MXU operands + approx reciprocal: loosened tolerance vs. the f32 reference.
        assert jnp.allclose(out, ref, atol=2e-2, rtol=2e-2), (
            f"batch={batch}, max err={jnp.max(jnp.abs(out - ref))}")

    # bf16 output path (halves the dominant output HBM stream).
    x = jax.random.normal(jax.random.fold_in(k_x, 999), (256, LATENT_DIM), jnp.float32)
    out_bf = jax.block_until_ready(decoder_forward(x, params, out_dtype=jnp.bfloat16))
    ref = reference_forward(x, w1, b1, w2, b2)
    assert out_bf.dtype == jnp.bfloat16 and out_bf.shape == (256, OUTPUT_DIM)
    assert jnp.allclose(out_bf.astype(jnp.float32), ref, atol=2e-2, rtol=2e-2)

    print("KERNEL_OK")
</pallas_src>

<mosaic_0001>
module attributes {stable_mosaic.version = 11 : i64} {
  func.func @decoder_kernel(%arg0: i32, %arg1: memref<8x256xf32, #tpu.memory_space<vmem>>, %arg2: memref<256x512xbf16, #tpu.memory_space<vmem>>, %arg3: memref<1x512xf32, #tpu.memory_space<vmem>>, %arg4: memref<512x1024xbf16, #tpu.memory_space<vmem>>, %arg5: memref<1x1024xf32, #tpu.memory_space<vmem>>, %arg6: memref<8x1024xf32, #tpu.memory_space<vmem>>) attributes {dimension_semantics = [#tpu.dimension_semantics<parallel>], iteration_bounds = array<i64: 1>, scalar_prefetch = 0 : i64, scratch_operands = 0 : i64, tpu.core_type = #tpu.core_type<tc>, window_params = [{transform_indices = @transform_0, window_bounds = array<i64: 8, 256>}, {pipeline_mode = #tpu.pipeline_mode<synchronous>, transform_indices = @transform_1, window_bounds = array<i64: 256, 512>}, {pipeline_mode = #tpu.pipeline_mode<synchronous>, transform_indices = @transform_2, window_bounds = array<i64: 1, 512>}, {pipeline_mode = #tpu.pipeline_mode<synchronous>, transform_indices = @transform_3, window_bounds = array<i64: 512, 1024>}, {pipeline_mode = #tpu.pipeline_mode<synchronous>, transform_indices = @transform_4, window_bounds = array<i64: 1, 1024>}, {transform_indices = @transform_5, window_bounds = array<i64: 8, 1024>}]} {
    %c0 = arith.constant 0 : index
    %c0_0 = arith.constant 0 : index
    %0 = vector.load %arg1[%c0, %c0_0] : memref<8x256xf32, #tpu.memory_space<vmem>>, vector<8x256xf32>
    %1 = arith.truncf %0 : vector<8x256xf32> to vector<8x256xbf16>
    %c0_1 = arith.constant 0 : index
    %c0_2 = arith.constant 0 : index
    %2 = vector.load %arg2[%c0_1, %c0_2] : memref<256x512xbf16, #tpu.memory_space<vmem>>, vector<256x512xbf16>
    %cst = arith.constant dense<0.000000e+00> : vector<8x512xf32>
    %3 = tpu.matmul %1, %2, %cst {dimension_numbers = #tpu.dot_dimension_numbers<[1], [0], [0], [1], [0, 0, 1, 1], [], []>} : vector<8x256xbf16>, vector<256x512xbf16>, vector<8x512xf32> -> vector<8x512xf32>
    %c0_3 = arith.constant 0 : index
    %c0_4 = arith.constant 0 : index
    %4 = vector.load %arg3[%c0_3, %c0_4] : memref<1x512xf32, #tpu.memory_space<vmem>>, vector<1x512xf32>
    %5 = vector.broadcast %4 : vector<1x512xf32> to vector<8x512xf32>
    %6 = arith.addf %3, %5 : vector<8x512xf32>
    %cst_5 = arith.constant 0.000000e+00 : f32
    %7 = vector.broadcast %cst_5 : f32 to vector<8x512xf32>
    %8 = arith.maximumf %6, %7 : vector<8x512xf32>
    %9 = arith.truncf %8 : vector<8x512xf32> to vector<8x512xbf16>
    %c0_6 = arith.constant 0 : index
    %c0_7 = arith.constant 0 : index
    %10 = vector.load %arg4[%c0_6, %c0_7] : memref<512x1024xbf16, #tpu.memory_space<vmem>>, vector<512x1024xbf16>
    %cst_8 = arith.constant dense<0.000000e+00> : vector<8x1024xf32>
    %11 = tpu.matmul %9, %10, %cst_8 {dimension_numbers = #tpu.dot_dimension_numbers<[1], [0], [0], [1], [0, 0, 1, 1], [], []>} : vector<8x512xbf16>, vector<512x1024xbf16>, vector<8x1024xf32> -> vector<8x1024xf32>
    %c0_9 = arith.constant 0 : index
    %c0_10 = arith.constant 0 : index
    %12 = vector.load %arg5[%c0_9, %c0_10] : memref<1x1024xf32, #tpu.memory_space<vmem>>, vector<1x1024xf32>
    %13 = vector.broadcast %12 : vector<1x1024xf32> to vector<8x1024xf32>
    %14 = arith.addf %11, %13 : vector<8x1024xf32>
    %cst_11 = arith.constant 0.000000e+00 : f32
    %15 = vector.broadcast %cst_11 : f32 to vector<8x1024xf32>
    %16 = arith.subf %15, %14 : vector<8x1024xf32>
    %17 = math.exp %16 : vector<8x1024xf32>
    %cst_12 = arith.constant 1.000000e+00 : f32
    %18 = vector.broadcast %cst_12 : f32 to vector<8x1024xf32>
    %19 = arith.addf %18, %17 : vector<8x1024xf32>
    %20 = tpu.reciprocal %19 {approx = true} : vector<8x1024xf32> -> vector<8x1024xf32>
    %c0_13 = arith.constant 0 : index
    %c0_14 = arith.constant 0 : index
    %21 = vector.load %arg6[%c0_13, %c0_14] : memref<8x1024xf32, #tpu.memory_space<vmem>>, vector<8x1024xf32>
    tpu.vector_store %arg6[%c0_13, %c0_14], %20 {strides = array<i32>} : memref<8x1024xf32, #tpu.memory_space<vmem>>, vector<8x1024xf32>,
    return
  }
  func.func @transform_0(%arg0: i32) -> (i32, i32) {
    %c0_i32 = arith.constant 0 : i32
    %c0_i32_0 = arith.constant 0 : i32
    return %arg0, %c0_i32 : i32, i32
  }
  func.func @transform_1(%arg0: i32) -> (i32, i32) {
    %c0_i32 = arith.constant 0 : i32
    %c0_i32_0 = arith.constant 0 : i32
    %c0_i32_1 = arith.constant 0 : i32
    return %c0_i32, %c0_i32_0 : i32, i32
  }
  func.func @transform_2(%arg0: i32) -> (i32, i32) {
    %c0_i32 = arith.constant 0 : i32
    %c0_i32_0 = arith.constant 0 : i32
    %c0_i32_1 = arith.constant 0 : i32
    return %c0_i32, %c0_i32_0 : i32, i32
  }
  func.func @transform_3(%arg0: i32) -> (i32, i32) {
    %c0_i32 = arith.constant 0 : i32
    %c0_i32_0 = arith.constant 0 : i32
    %c0_i32_1 = arith.constant 0 : i32
    return %c0_i32, %c0_i32_0 : i32, i32
  }
  func.func @transform_4(%arg0: i32) -> (i32, i32) {
    %c0_i32 = arith.constant 0 : i32
    %c0_i32_0 = arith.constant 0 : i32
    %c0_i32_1 = arith.constant 0 : i32
    return %c0_i32, %c0_i32_0 : i32, i32
  }
  func.func @transform_5(%arg0: i32) -> (i32, i32) {
    %c0_i32 = arith.constant 0 : i32
    %c0_i32_0 = arith.constant 0 : i32
    return %arg0, %c0_i32 : i32, i32
  }
}

</mosaic_0001>

<bundles_post_ra>
// kernel: tpu_custom_call.1
= control target key start
LH: loop header
LB: loop body
LE: loop exit
PB: predicated region body
PF: predicated region fallthrough
CT: control target
= control target key end

     0   :  { %10 = vsyncpa [#allocation3], 0  ;;  %s4581_s0 = inlined_call_operand.hbm [shape: f32[8,256], index: 0, kind: input, shape index: {}]   ;;  %s4582_s1 = inlined_call_operand.hbm [shape: bf16[256,512], index: 1, kind: input, shape index: {}]   ;;  %s4583_s2 = inlined_call_operand.hbm [shape: f32[1,512], index: 2, kind: input, shape index: {}]   ;;  %s4584_s3 = inlined_call_operand.hbm [shape: bf16[512,1024], index: 3, kind: input, shape index: {}]   ;;  %s4585_s4 = inlined_call_operand.hbm [shape: f32[1,1024], index: 4, kind: input, shape index: {}]   ;;  %s4586_s5 = inlined_call_operand.hbm [shape: f32[8,1024], index: 5, kind: output, shape index: {}]  }
   0x1   :  { %11 = vsyncpa [#allocation6], 0 }
   0x2   :  { %12 = vsyncpa [#allocation9], 0  ;;  %s29_s20 = sshll.u32 %s4582_s1, 4  ;;  %s30_s20 = int_to_ptr.hbm [resolvable:$true] %s29_s20 }
   0x3   :  { %13 = vsyncpa [#allocation4], 0  ;;  %s4434_s21 = smov [#allocation5]   ;;  %s53_s25 = sshll.u32 %s4584_s3, 4  ;;  %s54_s25 = int_to_ptr.hbm [resolvable:$true] %s53_s25 }
   0x4   :  { %s31_s22 = sshll.u32 %s4434_s21, 4  ;;  %s4435_s26 = smov 256   ;;  %s32_s22 = int_to_ptr.vmem [resolvable:$true] %s31_s22 }
   0x5   :  { %s4436_s27 = smov 16   ;;  %s4437_s28 = smov [#allocation8]  }
   0x6   :  { %37 = dma.hbm_to_vmem [thread:$0]  %s30_s20, 8192, %s32_s22, [#allocation6], %s4435_s26, %s4435_s26, %s4436_s27  }
   0x7   :  { %s55_s29 = sshll.u32 %s4437_s28, 4  ;;  %s4438_s30 = smov 512   ;;  %s56_s29 = int_to_ptr.vmem [resolvable:$true] %s55_s29 }
   0x8   :  { %s4439_s6 = smov 32   ;;  %s19_s8 = sshll.u32 %s4581_s0, 4  ;;  %s20_s8 = int_to_ptr.hbm [resolvable:$true] %s19_s8 }
   0x9   :  { %61 = dma.hbm_to_vmem [thread:$0]  %s54_s25, 32768, %s56_s29, [#allocation9], %s4438_s30, %s4438_s30, %s4439_s6  }
   0xa   :  { %s4440_s9 = smov [#allocation2]   ;;  %s43_s12 = sshll.u32 %s4583_s2, 4  ;;  %s44_s12 = int_to_ptr.hbm [resolvable:$true] %s43_s12 }
   0xb   :  { %s21_s10 = sshll.u32 %s4440_s9, 4  ;;  %s4441_s13 = smov [#allocation7]   ;;  %s22_s10 = int_to_ptr.vmem [resolvable:$true] %s21_s10 }
   0xc   :  { %24 = dma.hbm_to_vmem [thread:$0]  %s20_s8, 256, %s22_s10, [#allocation3]  }
   0xd   :  { %s45_s14 = sshll.u32 %s4441_s13, 4  ;;  %s67_s17 = sshll.u32 %s4585_s4, 4  ;;  %s46_s14 = int_to_ptr.vmem [resolvable:$true] %s45_s14  ;;  %s68_s17 = int_to_ptr.hbm [resolvable:$true] %s67_s17 }
   0xe   :  { %48 = dma.hbm_to_vmem [thread:$0]  %s44_s12, 64, %s46_s14, [#allocation6]  }
   0xf   :  { %s4442_s0 = smov [#allocation10]  }
  0x10   :  { %s69_s18 = sshll.u32 %s4442_s0, 4  ;;  %s70_s18 = int_to_ptr.vmem [resolvable:$true] %s69_s18 }
  0x11   :  { %72 = dma.hbm_to_vmem [thread:$0]  %s68_s17, 128, %s70_s18, [#allocation9]  }
  0x12   :  { %4426 = dma.done.wait [#allocation3], 256  }
  0x13   :  { %4427 = vsyncadd [#allocation3], 4294967040 }
  0x14   :  { %4428 = dma.done.wait [#allocation6], 8256  }
  0x15   :  { %4429 = vsyncadd [#allocation6], 4294959040 }
  0x16   :  { %4430 = dma.done.wait [#allocation9], 32896  }
  0x17   :  { %4431 = vsyncadd [#allocation9], 4294934400  ;;  %v2754_v0 = vld [vmem:[#allocation5 + $0xe0] sm:$0xf]  ;;  %v3950_v1 = vld [vmem:[#allocation5 + $0xec] sm:$0xf0] }
  0x18   :  { %v2882_v2 = vld [vmem:[#allocation5 + $0x1e0] sm:$0xf]  ;;  %v2755_v3 = vor.u32 %v3950_v1, %v2754_v0  ;;  %v3982_v4 = vld [vmem:[#allocation5 + $0x1ec] sm:$0xf0]  ;;  %v3948_v5 = vld [vmem:[#allocation5 + $0xe4] sm:$0xf] }
  0x19   :  { %v2756_v6 = vld [vmem:[#allocation5 + $0xf0] sm:$0xf0]  ;;  %v2883_v7 = vor.u32 %v3982_v4, %v2882_v2  ;;  %v3980_v9 = vld [vmem:[#allocation5 + $0x1e4] sm:$0xf]  ;;  %v2738_v11 = vld [vmem:[#allocation5 + $0xc0] sm:$0xf] }
  0x1a   :  { %v2759_v8 = vor.u32 %v3948_v5, %v2756_v6  ;;  %v2884_v10 = vld [vmem:[#allocation5 + $0x1f0] sm:$0xf0]  ;;  %491 = vmatpush.bf16.msra.mxu0 %v2755_v3  ;;  %v3946_v13 = vld [vmem:[#allocation5 + $0xcc] sm:$0xf0]  ;;  %v2866_v14 = vld [vmem:[#allocation5 + $0x1c0] sm:$0xf] }
  0x1b   :  { %v2887_v12 = vor.u32 %v3980_v9, %v2884_v10  ;;  %v3978_v15 = vld [vmem:[#allocation5 + $0x1cc] sm:$0xf0]  ;;  %504 = vmatpush.bf16.msra.mxu1 %v2883_v7  ;;  %v2739_v16 = vor.u32 %v3946_v13, %v2738_v11  ;;  %v3944_v18 = vld [vmem:[#allocation5 + $0xc4] sm:$0xf]  ;;  %v2740_v19 = vld [vmem:[#allocation5 + $0xd0] sm:$0xf0] }
  0x1c   :  { %517 = vmatpush.bf16.msra.mxu2 %v2759_v8  ;;  %v2867_v17 = vor.u32 %v3978_v15, %v2866_v14  ;;  %v3976_v20 = vld [vmem:[#allocation5 + $0x1c4] sm:$0xf]  ;;  %v2743_v21 = vor.u32 %v3944_v18, %v2740_v19  ;;  %v2868_v22 = vld [vmem:[#allocation5 + $0x1d0] sm:$0xf0]  ;;  %v2722_v23 = vld [vmem:[#allocation5 + $0xa0] sm:$0xf] }
  0x1d   :  { %530 = vmatpush.bf16.msra.mxu3 %v2887_v12  ;;  %v3942_v24 = vld [vmem:[#allocation5 + $0xac] sm:$0xf0]  ;;  %v2871_v25 = vor.u32 %v3976_v20, %v2868_v22  ;;  %v2850_v26 = vld [vmem:[#allocation5 + $0x1a0] sm:$0xf]  ;;  %v3940_v28 = vld [vmem:[#allocation5 + $0xa4] sm:$0xf] }
  0x1e   :  { %v3974_v27 = vld [vmem:[#allocation5 + $0x1ac] sm:$0xf0]  ;;  %492 = vmatpush.bf16.msra.mxu0 %v2739_v16  ;;  %v2723_v29 = vor.u32 %v3942_v24, %v2722_v23  ;;  %v2724_v30 = vld [vmem:[#allocation5 + $0xb0] sm:$0xf0]  ;;  %v3972_v31 = vld [vmem:[#allocation5 + $0x1a4] sm:$0xf] }
  0x1f   :  { %v2852_v32 = vld [vmem:[#allocation5 + $0x1b0] sm:$0xf0]  ;;  %505 = vmatpush.bf16.msra.mxu1 %v2867_v17  ;;  %v2851_v33 = vor.u32 %v3974_v27, %v2850_v26  ;;  %v2727_v34 = vor.u32 %v3940_v28, %v2724_v30  ;;  %v2706_v35 = vld [vmem:[#allocation5 + $0x80] sm:$0xf]  ;;  %v3938_v36 = vld [vmem:[#allocation5 + $0x8c] sm:$0xf0] }
  0x20   :  { %518 = vmatpush.bf16.msra.mxu2 %v2743_v21  ;;  %v2834_v37 = vld [vmem:[#allocation5 + $0x180] sm:$0xf]  ;;  %v2855_v38 = vor.u32 %v3972_v31, %v2852_v32  ;;  %v3970_v39 = vld [vmem:[#allocation5 + $0x18c] sm:$0xf0]  ;;  %v3936_v40 = vld [vmem:[#allocation5 + $0x84] sm:$0xf]  ;;  %v2707_v44 = vor.u32 %v3938_v36, %v2706_v35 }
  0x21   :  { %531 = vmatpush.bf16.msra.mxu3 %v2871_v25  ;;  %v2708_v41 = vld [vmem:[#allocation5 + $0x90] sm:$0xf0]  ;;  %v3968_v42 = vld [vmem:[#allocation5 + $0x184] sm:$0xf]  ;;  %v2835_v45 = vor.u32 %v3970_v39, %v2834_v37  ;;  %v2690_v47 = vld [vmem:[#allocation5 + $0x60] sm:$0xf] }
  0x22   :  { %v2836_v43 = vld [vmem:[#allocation5 + $0x190] sm:$0xf0]  ;;  %493 = vmatpush.bf16.msra.mxu0 %v2723_v29  ;;  %v2711_v46 = vor.u32 %v3936_v40, %v2708_v41  ;;  %v3934_v48 = vld [vmem:[#allocation5 + $0x6c] sm:$0xf0]  ;;  %v2818_v49 = vld [vmem:[#allocation5 + $0x160] sm:$0xf] }
  0x23   :  { %506 = vmatpush.bf16.msra.mxu1 %v2851_v33  ;;  %v2839_v50 = vor.u32 %v3968_v42, %v2836_v43  ;;  %v3966_v51 = vld [vmem:[#allocation5 + $0x16c] sm:$0xf0]  ;;  %v3932_v52 = vld [vmem:[#allocation5 + $0x64] sm:$0xf]  ;;  %v2692_v53 = vld [vmem:[#allocation5 + $0x70] sm:$0xf0]  ;;  %v2691_v56 = vor.u32 %v3934_v48, %v2690_v47 }
  0x24   :  { %519 = vmatpush.bf16.msra.mxu2 %v2727_v34  ;;  %v3964_v54 = vld [vmem:[#allocation5 + $0x164] sm:$0xf]  ;;  %v2820_v55 = vld [vmem:[#allocation5 + $0x170] sm:$0xf0]  ;;  %v2819_v57 = vor.u32 %v3966_v51, %v2818_v49  ;;  %v2695_v58 = vor.u32 %v3932_v52, %v2692_v53  ;;  %v2674_v59 = vld [vmem:[#allocation5 + $0x40] sm:$0xf] }
  0x25   :  { %532 = vmatpush.bf16.msra.mxu3 %v2855_v38  ;;  %v3930_v60 = vld [vmem:[#allocation5 + $0x4c] sm:$0xf0]  ;;  %v2802_v61 = vld [vmem:[#allocation5 + $0x140] sm:$0xf]  ;;  %v2823_v62 = vor.u32 %v3964_v54, %v2820_v55  ;;  %v3928_v0 = vld [vmem:[#allocation5 + $0x44] sm:$0xf] }
  0x26   :  { %494 = vmatpush.bf16.msra.mxu0 %v2707_v44  ;;  %v3962_v63 = vld [vmem:[#allocation5 + $0x14c] sm:$0xf0]  ;;  %v2676_v1 = vld [vmem:[#allocation5 + $0x50] sm:$0xf0]  ;;  %v3960_v2 = vld [vmem:[#allocation5 + $0x144] sm:$0xf]  ;;  %v2675_v4 = vor.u32 %v3930_v60, %v2674_v59 }
  0x27   :  { %507 = vmatpush.bf16.msra.mxu1 %v2835_v45  ;;  %v2804_v3 = vld [vmem:[#allocation5 + $0x150] sm:$0xf0]  ;;  %v2803_v5 = vor.u32 %v3962_v63, %v2802_v61  ;;  %v2679_v6 = vor.u32 %v3928_v0, %v2676_v1  ;;  %v2658_v7 = vld [vmem:[#allocation5 + $0x20] sm:$0xf]  ;;  %v3926_v8 = vld [vmem:[#allocation5 + $0x2c] sm:$0xf0] }
  0x28   :  { %520 = vmatpush.bf16.msra.mxu2 %v2711_v46  ;;  %v2786_v9 = vld [vmem:[#allocation5 + $0x120] sm:$0xf]  ;;  %v2807_v10 = vor.u32 %v3960_v2, %v2804_v3  ;;  %v3958_v11 = vld [vmem:[#allocation5 + $0x12c] sm:$0xf0]  ;;  %v3924_v12 = vld [vmem:[#allocation5 + $0x24] sm:$0xf]  ;;  %v2659_v16 = vor.u32 %v3926_v8, %v2658_v7 }
  0x29   :  { %533 = vmatpush.bf16.msra.mxu3 %v2839_v50  ;;  %v2660_v13 = vld [vmem:[#allocation5 + $0x30] sm:$0xf0]  ;;  %v3956_v14 = vld [vmem:[#allocation5 + $0x124] sm:$0xf]  ;;  %v2642_v17 = vld [vmem:[#allocation5] sm:$0xf]  ;;  %v2787_v19 = vor.u32 %v3958_v11, %v2786_v9 }
  0x2a   :  { %495 = vmatpush.bf16.msra.mxu0 %v2691_v56  ;;  %v2788_v15 = vld [vmem:[#allocation5 + $0x130] sm:$0xf0]  ;;  %v3922_v18 = vld [vmem:[#allocation5 + $0xc] sm:$0xf0]  ;;  %v2663_v20 = vor.u32 %v3924_v12, %v2660_v13  ;;  %v2770_v21 = vld [vmem:[#allocation5 + $0x100] sm:$0xf] }
  0x2b   :  { %508 = vmatpush.bf16.msra.mxu1 %v2819_v57  ;;  %v3954_v22 = vld [vmem:[#allocation5 + $0x10c] sm:$0xf0]  ;;  %v3920_v23 = vld [vmem:[#allocation5 + $0x4] sm:$0xf]  ;;  %v2791_v24 = vor.u32 %v3956_v14, %v2788_v15  ;;  %v2644_v25 = vld [vmem:[#allocation5 + $0x10] sm:$0xf0]  ;;  %v2643_v31 = vor.u32 %v3922_v18, %v2642_v17 }
  0x2c   :  { %521 = vmatpush.bf16.msra.mxu2 %v2695_v58  ;;  %v3952_v26 = vld [vmem:[#allocation5 + $0x104] sm:$0xf]  ;;  %v2772_v27 = vld [vmem:[#allocation5 + $0x110] sm:$0xf0]  ;;  %v2762_v28 = vld [vmem:[#allocation5 + $0xe8] sm:$0xf]  ;;  %v2771_v35 = vor.u32 %v3954_v22, %v2770_v21  ;;  %v2647_v36 = vor.u32 %v3920_v23, %v2644_v25 }
  0x2d   :  { %534 = vmatpush.bf16.msra.mxu3 %v2823_v62  ;;  %v3951_v29 = vld [vmem:[#allocation5 + $0xf4] sm:$0xf0]  ;;  %v2890_v30 = vld [vmem:[#allocation5 + $0x1e8] sm:$0xf]  ;;  %v3949_v33 = vld [vmem:[#allocation5 + $0xec] sm:$0xf]  ;;  %v2775_v40 = vor.u32 %v3952_v26, %v2772_v27 }
  0x2e   :  { %496 = vmatpush.bf16.msra.mxu0 %v2675_v4  ;;  %v3983_v32 = vld [vmem:[#allocation5 + $0x1f4] sm:$0xf0]  ;;  %v2764_v34 = vld [vmem:[#allocation5 + $0xf8] sm:$0xf0]  ;;  %v3981_v37 = vld [vmem:[#allocation5 + $0x1ec] sm:$0xf]  ;;  %v2763_v41 = vor.u32 %v3951_v29, %v2762_v28 }
  0x2f   :  { %509 = vmatpush.bf16.msra.mxu1 %v2803_v5  ;;  %v2892_v38 = vld [vmem:[#allocation5 + $0x1f8] sm:$0xf0]  ;;  %v93_v39 = vld [vmem:[#allocation2] sm:$0xff]  ;;  %v2891_v43 = vor.u32 %v3983_v32, %v2890_v30  ;;  %v2767_v44 = vor.u32 %v3949_v33, %v2764_v34  ;;  %v2746_v45 = vld [vmem:[#allocation5 + $0xc8] sm:$0xf]  ;;  %s4443_s2 = smov [#allocation11]  }
  0x30   :  { %522 = vmatpush.bf16.msra.mxu2 %v2679_v6  ;;  %v94_v42 = vld [vmem:[#allocation2 + $0x8] sm:$0xff]  ;;  %v2874_v47 = vld [vmem:[#allocation5 + $0x1c8] sm:$0xf]  ;;  %v2895_v48 = vor.u32 %v3981_v37, %v2892_v38  ;;  %v4489_v49 = vpack.c.bf16 %v93_v39, %v93_v39  ;;  %v3945_v51 = vld [vmem:[#allocation5 + $0xcc] sm:$0xf]  ;;  %s2626_s4 = sshll.u32 %s4443_s2, 4  ;;  %s2627_s4 = int_to_ptr.vmem [resolvable:$true] %s2626_s4 }
  0x31   :  { %535 = vmatpush.bf16.msra.mxu3 %v2807_v10  ;;  %v3947_v46 = vld [vmem:[#allocation5 + $0xd4] sm:$0xf0]  ;;  %v2748_v52 = vld [vmem:[#allocation5 + $0xd8] sm:$0xf0]  ;;  %v4491_v53 = vpack.c.bf16 %v94_v42, %v94_v42  ;;  %v3977_v54 = vld [vmem:[#allocation5 + $0x1cc] sm:$0xf] }
  0x32   :  { %497 = vmatpush.bf16.msra.mxu0 %v2659_v16  ;;  %v3979_v50 = vld [vmem:[#allocation5 + $0x1d4] sm:$0xf0]  ;;  %v2876_v55 = vld [vmem:[#allocation5 + $0x1d8] sm:$0xf0]  ;;  %v2747_v56 = vor.u32 %v3947_v46, %v2746_v45  ;;  %v2751_v58 = vor.u32 %v3945_v51, %v2748_v52  ;;  %v2730_v59 = vld [vmem:[#allocation5 + $0xa8] sm:$0xf] }
  0x33   :  { %510 = vmatpush.bf16.msra.mxu1 %v2787_v19  ;;  %v2875_v57 = vor.u32 %v3979_v50, %v2874_v47  ;;  %v3943_v60 = vld [vmem:[#allocation5 + $0xb4] sm:$0xf0]  ;;  %v2858_v61 = vld [vmem:[#allocation5 + $0x1a8] sm:$0xf]  ;;  %v2879_v62 = vor.u32 %v3977_v54, %v2876_v55  ;;  %v3941_v0 = vld [vmem:[#allocation5 + $0xac] sm:$0xf] }
  0x34   :  { %523 = vmatpush.bf16.msra.mxu2 %v2663_v20  ;;  %v3975_v63 = vld [vmem:[#allocation5 + $0x1b4] sm:$0xf0]  ;;  %v2732_v1 = vld [vmem:[#allocation5 + $0xb8] sm:$0xf0]  ;;  %v3973_v2 = vld [vmem:[#allocation5 + $0x1ac] sm:$0xf]  ;;  %v2731_v4 = vor.u32 %v3943_v60, %v2730_v59 }
  0x35   :  { %536 = vmatpush.bf16.msra.mxu3 %v2791_v24  ;;  %v2860_v3 = vld [vmem:[#allocation5 + $0x1b8] sm:$0xf0]  ;;  %v2859_v5 = vor.u32 %v3975_v63, %v2858_v61  ;;  %v2735_v6 = vor.u32 %v3941_v0, %v2732_v1  ;;  %v2714_v7 = vld [vmem:[#allocation5 + $0x88] sm:$0xf]  ;;  %v3939_v8 = vld [vmem:[#allocation5 + $0x94] sm:$0xf0] }
  0x36   :  { %498 = vmatpush.bf16.msra.mxu0 %v2643_v31  ;;  %v2842_v9 = vld [vmem:[#allocation5 + $0x188] sm:$0xf]  ;;  %v2863_v10 = vor.u32 %v3973_v2, %v2860_v3  ;;  %v3971_v11 = vld [vmem:[#allocation5 + $0x194] sm:$0xf0]  ;;  %v3937_v12 = vld [vmem:[#allocation5 + $0x8c] sm:$0xf]  ;;  %v2715_v16 = vor.u32 %v3939_v8, %v2714_v7 }
  0x37   :  { %511 = vmatpush.bf16.msra.mxu1 %v2771_v35  ;;  %v2716_v13 = vld [vmem:[#allocation5 + $0x98] sm:$0xf0]  ;;  %v3969_v14 = vld [vmem:[#allocation5 + $0x18c] sm:$0xf]  ;;  %v2843_v17 = vor.u32 %v3971_v11, %v2842_v9  ;;  %v2698_v19 = vld [vmem:[#allocation5 + $0x68] sm:$0xf] }
  0x38   :  { %524 = vmatpush.bf16.msra.mxu2 %v2647_v36  ;;  %v2844_v15 = vld [vmem:[#allocation5 + $0x198] sm:$0xf0]  ;;  %v2719_v18 = vor.u32 %v3937_v12, %v2716_v13  ;;  %v3935_v20 = vld [vmem:[#allocation5 + $0x74] sm:$0xf0]  ;;  %v2826_v21 = vld [vmem:[#allocation5 + $0x168] sm:$0xf] }
  0x39   :  { %537 = vmatpush.bf16.msra.mxu3 %v2775_v40  ;;  %499 = vmatmul.bf16.vlgmr.msra.gmra.mxu0 %v4489_v49  ;;  %v2847_v22 = vor.u32 %v3969_v14, %v2844_v15  ;;  %v3967_v23 = vld [vmem:[#allocation5 + $0x174] sm:$0xf0]  ;;  %v3933_v24 = vld [vmem:[#allocation5 + $0x6c] sm:$0xf]  ;;  %v2700_v25 = vld [vmem:[#allocation5 + $0x78] sm:$0xf0]  ;;  %v2699_v28 = vor.u32 %v3935_v20, %v2698_v19 }
  0x3a   :  { %543 = vmatpush.bf16.msrb.mxu0 %v2763_v41  ;;  %512 = vmatmul.bf16.vlgmr.msra.gmra.mxu1 %v4491_v53  ;;  %v3965_v26 = vld [vmem:[#allocation5 + $0x16c] sm:$0xf]  ;;  %v2828_v27 = vld [vmem:[#allocation5 + $0x178] sm:$0xf0]  ;;  %v2827_v29 = vor.u32 %v3967_v23, %v2826_v21  ;;  %v2703_v30 = vor.u32 %v3933_v24, %v2700_v25  ;;  %v2682_v31 = vld [vmem:[#allocation5 + $0x48] sm:$0xf] }
  0x3b   :  { %556 = vmatpush.bf16.msrb.mxu1 %v2891_v43  ;;  %525 = vmatmul.bf16.vlgmr.msra.gmra.mxu2 %v4489_v49  ;;  %v3931_v32 = vld [vmem:[#allocation5 + $0x54] sm:$0xf0]  ;;  %v2810_v33 = vld [vmem:[#allocation5 + $0x148] sm:$0xf]  ;;  %v2831_v34 = vor.u32 %v3965_v26, %v2828_v27  ;;  %v3929_v36 = vld [vmem:[#allocation5 + $0x4c] sm:$0xf] }
  0x3c   :  { %569 = vmatpush.bf16.msrb.mxu2 %v2767_v44  ;;  %538 = vmatmul.bf16.vlgmr.msra.gmra.mxu3 %v4491_v53  ;;  %v3963_v35 = vld [vmem:[#allocation5 + $0x154] sm:$0xf0]  ;;  %v2684_v37 = vld [vmem:[#allocation5 + $0x58] sm:$0xf0]  ;;  %v3961_v38 = vld [vmem:[#allocation5 + $0x14c] sm:$0xf]  ;;  %v2683_v40 = vor.u32 %v3931_v32, %v2682_v31 }
  0x3d   :  { %582 = vmatpush.bf16.msrb.mxu3 %v2895_v48  ;;  %v2812_v39 = vld [vmem:[#allocation5 + $0x158] sm:$0xf0]  ;;  %v2811_v41 = vor.u32 %v3963_v35, %v2810_v33  ;;  %v2687_v42 = vor.u32 %v3929_v36, %v2684_v37  ;;  %v2666_v43 = vld [vmem:[#allocation5 + $0x28] sm:$0xf]  ;;  %v3927_v44 = vld [vmem:[#allocation5 + $0x34] sm:$0xf0] }
  0x3e   :  { %544 = vmatpush.bf16.msrb.mxu0 %v2747_v56  ;;  %v2794_v45 = vld [vmem:[#allocation5 + $0x128] sm:$0xf]  ;;  %v2815_v46 = vor.u32 %v3961_v38, %v2812_v39  ;;  %v3959_v47 = vld [vmem:[#allocation5 + $0x134] sm:$0xf0]  ;;  %v3925_v48 = vld [vmem:[#allocation5 + $0x2c] sm:$0xf]  ;;  %v2667_v54 = vor.u32 %v3927_v44, %v2666_v43 }
  0x3f   :  { %557 = vmatpush.bf16.msrb.mxu1 %v2875_v57  ;;  %v2668_v50 = vld [vmem:[#allocation5 + $0x38] sm:$0xf0]  ;;  %v3957_v51 = vld [vmem:[#allocation5 + $0x12c] sm:$0xf]  ;;  %v2650_v55 = vld [vmem:[#allocation5 + $0x8] sm:$0xf]  ;;  %v2795_v56 = vor.u32 %v3959_v47, %v2794_v45 }
  0x40   :  { %570 = vmatpush.bf16.msrb.mxu2 %v2751_v58  ;;  %v2796_v52 = vld [vmem:[#allocation5 + $0x138] sm:$0xf0]  ;;  %v2671_v57 = vor.u32 %v3925_v48, %v2668_v50  ;;  %v3923_v58 = vld [vmem:[#allocation5 + $0x14] sm:$0xf0]  ;;  %v2778_v59 = vld [vmem:[#allocation5 + $0x108] sm:$0xf] }
  0x41   :  { %583 = vmatpush.bf16.msrb.mxu3 %v2879_v62  ;;  %v3955_v60 = vld [vmem:[#allocation5 + $0x114] sm:$0xf0]  ;;  %v2799_v61 = vor.u32 %v3957_v51, %v2796_v52  ;;  %v3921_v62 = vld [vmem:[#allocation5 + $0xc] sm:$0xf]  ;;  %v2652_v63 = vld [vmem:[#allocation5 + $0x18] sm:$0xf0] }
  0x42   :  { %545 = vmatpush.bf16.msrb.mxu0 %v2731_v4  ;;  %v3953_v0 = vld [vmem:[#allocation5 + $0x10c] sm:$0xf]  ;;  %v2780_v1 = vld [vmem:[#allocation5 + $0x118] sm:$0xf0]  ;;  %v3122_v2 = vld [vmem:[#allocation8 + $0x1c0] sm:$0xf]  ;;  %v2651_v4 = vor.u32 %v3923_v58, %v2650_v55  ;;  %v2779_v7 = vor.u32 %v3955_v60, %v2778_v59  ;;  %v2655_v8 = vor.u32 %v3921_v62, %v2652_v63 }
  0x43   :  { %558 = vmatpush.bf16.msrb.mxu1 %v2859_v5  ;;  %v4044_v3 = vld [vmem:[#allocation8 + $0x1dc] sm:$0xf0]  ;;  %v2783_v9 = vor.u32 %v3953_v0, %v2780_v1  ;;  %s2628_s21 = sshll.u32 %s4586_s5, 4  ;;  %s2629_s21 = int_to_ptr.hbm [resolvable:$true] %s2628_s21 }
  0x44   :  { %571 = vmatpush.bf16.msrb.mxu2 %v2735_v6  ;;  %v3378_v5 = vld [vmem:[#allocation8 + $0x3c0] sm:$0xf] }
  0x45   :  { %584 = vmatpush.bf16.msrb.mxu3 %v2863_v10  ;;  %v4108_v6 = vld [vmem:[#allocation8 + $0x3dc] sm:$0xf0]  ;;  %v3123_v10 = vor.u32 %v4044_v3, %v3122_v2 }
  0x46   :  { %546 = vmatpush.bf16.msrb.mxu0 %v2715_v16  ;;  %v3634_v11 = vld [vmem:[#allocation8 + $0x5c0] sm:$0xf]  ;;  %v3379_v15 = vor.u32 %v4108_v6, %v3378_v5 }
  0x47   :  { %559 = vmatpush.bf16.msrb.mxu1 %v2843_v17  ;;  %v4172_v12 = vld [vmem:[#allocation8 + $0x5dc] sm:$0xf0] }
  0x48   :  { %572 = vmatpush.bf16.msrb.mxu2 %v2719_v18  ;;  %v3090_v13 = vld [vmem:[#allocation8 + $0x180] sm:$0xf]  ;;  %v3635_v18 = vor.u32 %v4172_v12, %v3634_v11  ;;  %v4040_v12 = vld [vmem:[#allocation8 + $0x1c4] sm:$0xf] }
  0x49   :  { %585 = vmatpush.bf16.msrb.mxu3 %v2847_v22  ;;  %v4036_v14 = vld [vmem:[#allocation8 + $0x19c] sm:$0xf0] }
  0x4a   :  { %547 = vmatpush.bf16.msrb.mxu0 %v2699_v28  ;;  %v3346_v16 = vld [vmem:[#allocation8 + $0x380] sm:$0xf]  ;;  %v3091_v19 = vor.u32 %v4036_v14, %v3090_v13  ;;  %v3124_v14 = vld [vmem:[#allocation8 + $0x1e0] sm:$0xf0] }
  0x4b   :  { %560 = vmatpush.bf16.msrb.mxu1 %v2827_v29  ;;  %v4100_v17 = vld [vmem:[#allocation8 + $0x39c] sm:$0xf0] }
  0x4c   :  { %573 = vmatpush.bf16.msrb.mxu2 %v2703_v30  ;;  %v3602_v20 = vld [vmem:[#allocation8 + $0x580] sm:$0xf]  ;;  %v3347_v24 = vor.u32 %v4100_v17, %v3346_v16  ;;  %v4104_v17 = vld [vmem:[#allocation8 + $0x3c4] sm:$0xf] }
  0x4d   :  { %586 = vmatpush.bf16.msrb.mxu3 %v2831_v34  ;;  %v4164_v21 = vld [vmem:[#allocation8 + $0x59c] sm:$0xf0] }
  0x4e   :  { %548 = vmatpush.bf16.msrb.mxu0 %v2683_v40  ;;  %v3058_v22 = vld [vmem:[#allocation8 + $0x140] sm:$0xf]  ;;  %v3603_v29 = vor.u32 %v4164_v21, %v3602_v20  ;;  %v3127_v20 = vor.u32 %v4040_v12, %v3124_v14 }
  0x4f   :  { %561 = vmatpush.bf16.msrb.mxu1 %v2811_v41  ;;  %v4028_v23 = vld [vmem:[#allocation8 + $0x15c] sm:$0xf0] }
  0x50   :  { %574 = vmatpush.bf16.msrb.mxu2 %v2687_v42  ;;  %v3890_v25 = vld [vmem:[#allocation8 + $0x7c0] sm:$0xf]  ;;  %v3059_v31 = vor.u32 %v4028_v23, %v3058_v22  ;;  %v4032_v22 = vld [vmem:[#allocation8 + $0x184] sm:$0xf] }
  0x51   :  { %587 = vmatpush.bf16.msrb.mxu3 %v2815_v46  ;;  %v3314_v26 = vld [vmem:[#allocation8 + $0x340] sm:$0xf]  ;;  %v3092_v23 = vld [vmem:[#allocation8 + $0x1a0] sm:$0xf0] }
  0x52   :  { %549 = vmatpush.bf16.msrb.mxu0 %v2667_v54  ;;  %v4092_v27 = vld [vmem:[#allocation8 + $0x35c] sm:$0xf0] }
  0x53   :  { %562 = vmatpush.bf16.msrb.mxu1 %v2795_v56  ;;  %v4236_v28 = vld [vmem:[#allocation8 + $0x7dc] sm:$0xf0]  ;;  %v3315_v36 = vor.u32 %v4092_v27, %v3314_v26  ;;  %v3348_v26 = vld [vmem:[#allocation8 + $0x3a0] sm:$0xf0]  ;;  %v3095_v27 = vor.u32 %v4032_v22, %v3092_v23 }
  0x54   :  { %575 = vmatpush.bf16.msrb.mxu2 %v2671_v57  ;;  %v3891_v30 = vor.u32 %v4236_v28, %v3890_v25  ;;  %v3026_v32 = vld [vmem:[#allocation8 + $0x100] sm:$0xf]  ;;  %v4096_v25 = vld [vmem:[#allocation8 + $0x384] sm:$0xf] }
  0x55   :  { %588 = vmatpush.bf16.msrb.mxu3 %v2799_v61  ;;  %v3570_v33 = vld [vmem:[#allocation8 + $0x540] sm:$0xf]  ;;  %v4024_v28 = vld [vmem:[#allocation8 + $0x144] sm:$0xf] }
  0x56   :  { %550 = vmatpush.bf16.msrb.mxu0 %v2651_v4  ;;  %v4156_v34 = vld [vmem:[#allocation8 + $0x55c] sm:$0xf0] }
  0x57   :  { %563 = vmatpush.bf16.msrb.mxu1 %v2779_v7  ;;  %v4020_v35 = vld [vmem:[#allocation8 + $0x11c] sm:$0xf0]  ;;  %v3571_v41 = vor.u32 %v4156_v34, %v3570_v33  ;;  %v4016_v34 = vld [vmem:[#allocation8 + $0x104] sm:$0xf] }
  0x58   :  { %576 = vmatpush.bf16.msrb.mxu2 %v2655_v8  ;;  %v3858_v37 = vld [vmem:[#allocation8 + $0x780] sm:$0xf] }
  0x59   :  { %589 = vmatpush.bf16.msrb.mxu3 %v2783_v9  ;;  %551 = vmatmul.bf16.vlgmr.msrb.gmra.mxu0 %v4489_v49  ;;  %v4228_v38 = vld [vmem:[#allocation8 + $0x79c] sm:$0xf0] }
  0x5a   :  { %2157 = vmatpush.bf16.msra.mxu0 %v3123_v10  ;;  %564 = vmatmul.bf16.vlgmr.msrb.gmra.mxu1 %v4491_v53  ;;  %v4084_v39 = vld [vmem:[#allocation8 + $0x31c] sm:$0xf0]  ;;  %v3859_v40 = vor.u32 %v4228_v38, %v3858_v37  ;;  %v4080_v37 = vld [vmem:[#allocation8 + $0x304] sm:$0xf] }
  0x5b   :  { %2170 = vmatpush.bf16.msra.mxu1 %v3379_v15  ;;  %577 = vmatmul.bf16.vlgmr.msrb.gmra.mxu2 %v4489_v49  ;;  %v3282_v49 = vld [vmem:[#allocation8 + $0x300] sm:$0xf]  ;;  %v3284_v38 = vld [vmem:[#allocation8 + $0x320] sm:$0xf0] }
  0x5c   :  { %590 = vmatmul.bf16.vlgmr.msrb.gmra.mxu3 %v4491_v53  ;;  %2183 = vmatpush.bf16.msra.mxu2 %v3635_v18  ;;  %v3027_v53 = vor.u32 %v4020_v35, %v3026_v32  ;;  %v2994_v42 = vld [vmem:[#allocation8 + $0xc0] sm:$0xf]  ;;  %v3283_v46 = vor.u32 %v4084_v39, %v3282_v49  ;;  %v3380_v18 = vld [vmem:[#allocation8 + $0x3e0] sm:$0xf0] }
  0x5d   :  { %2196 = vmatpush.bf16.msra.mxu3 %v3891_v30  ;;  %v3538_v43 = vld [vmem:[#allocation8 + $0x500] sm:$0xf]  ;;  %v3351_v30 = vor.u32 %v4096_v25, %v3348_v26  ;;  %v3316_v32 = vld [vmem:[#allocation8 + $0x360] sm:$0xf0] }
  0x5e   :  { %2158 = vmatpush.bf16.msra.mxu0 %v3091_v19  ;;  %v4148_v44 = vld [vmem:[#allocation8 + $0x51c] sm:$0xf0]  ;;  %v3028_v35 = vld [vmem:[#allocation8 + $0x120] sm:$0xf0] }
  0x5f   :  { %2171 = vmatpush.bf16.msra.mxu1 %v3347_v24  ;;  %v4012_v45 = vld [vmem:[#allocation8 + $0xdc] sm:$0xf0]  ;;  %v3539_v54 = vor.u32 %v4148_v44, %v3538_v43  ;;  %v3383_v24 = vor.u32 %v4104_v17, %v3380_v18  ;;  %v3031_v49 = vor.u32 %v4016_v34, %v3028_v35  ;;  %v4008_v39 = vld [vmem:[#allocation8 + $0xc4] sm:$0xf] }
  0x60   :  { %2184 = vmatpush.bf16.msra.mxu2 %v3603_v29  ;;  %v3826_v47 = vld [vmem:[#allocation8 + $0x740] sm:$0xf]  ;;  %v2995_v55 = vor.u32 %v4012_v45, %v2994_v42  ;;  %v3060_v29 = vld [vmem:[#allocation8 + $0x160] sm:$0xf0] }
  0x61   :  { %2197 = vmatpush.bf16.msra.mxu3 %v3859_v40  ;;  %v4220_v48 = vld [vmem:[#allocation8 + $0x75c] sm:$0xf0]  ;;  %v3063_v33 = vor.u32 %v4024_v28, %v3060_v29  ;;  %v2996_v40 = vld [vmem:[#allocation8 + $0xe0] sm:$0xf0] }
  0x62   :  { %2159 = vmatpush.bf16.msra.mxu0 %v3059_v31  ;;  %v3250_v50 = vld [vmem:[#allocation8 + $0x2c0] sm:$0xf]  ;;  %v3827_v52 = vor.u32 %v4220_v48, %v3826_v47  ;;  %v4088_v31 = vld [vmem:[#allocation8 + $0x344] sm:$0xf] }
  0x63   :  { %2172 = vmatpush.bf16.msra.mxu1 %v3315_v36  ;;  %v4076_v51 = vld [vmem:[#allocation8 + $0x2dc] sm:$0xf0]  ;;  %v3319_v36 = vor.u32 %v4088_v31, %v3316_v32  ;;  %v4000_v44 = vld [vmem:[#allocation8 + $0x84] sm:$0xf] }
  0x64   :  { %2185 = vmatpush.bf16.msra.mxu2 %v3571_v41  ;;  %v2962_v56 = vld [vmem:[#allocation8 + $0x80] sm:$0xf]  ;;  %v3251_v60 = vor.u32 %v4076_v51, %v3250_v50  ;;  %v3287_v41 = vor.u32 %v4080_v37, %v3284_v38  ;;  %v4072_v51 = vld [vmem:[#allocation8 + $0x2c4] sm:$0xf] }
  0x65   :  { %v3506_v57 = vld [vmem:[#allocation8 + $0x4c0] sm:$0xf]  ;;  %2198 = vmatpush.bf16.msra.mxu3 %v3827_v52  ;;  %v3188_v17 = vld [vmem:[#allocation8 + $0x260] sm:$0xf0] }
  0x66   :  { %2160 = vmatpush.bf16.msra.mxu0 %v3027_v53  ;;  %v4140_v58 = vld [vmem:[#allocation8 + $0x4dc] sm:$0xf0]  ;;  %v2999_v53 = vor.u32 %v4008_v39, %v2996_v40  ;;  %v4048_v25 = vld [vmem:[#allocation8 + $0x204] sm:$0xf] }
  0x67   :  { %2173 = vmatpush.bf16.msra.mxu1 %v3283_v46  ;;  %v4004_v59 = vld [vmem:[#allocation8 + $0x9c] sm:$0xf0]  ;;  %v3507_v2 = vor.u32 %v4140_v58, %v3506_v57  ;;  %v2964_v46 = vld [vmem:[#allocation8 + $0xa0] sm:$0xf0] }
  0x68   :  { %v3794_v61 = vld [vmem:[#allocation8 + $0x700] sm:$0xf]  ;;  %2186 = vmatpush.bf16.msra.mxu2 %v3539_v54  ;;  %v2963_v3 = vor.u32 %v4004_v59, %v2962_v56  ;;  %v2967_v47 = vor.u32 %v4000_v44, %v2964_v46  ;;  %v3252_v54 = vld [vmem:[#allocation8 + $0x2e0] sm:$0xf0]  ;;  %v4501_v44 = vld [vmem:[#allocation7] sm:$0xf] }
  0x69   :  { %v4212_v62 = vld [vmem:[#allocation8 + $0x71c] sm:$0xf0]  ;;  %v3992_v58 = vld [vmem:[#allocation8 + $0x44] sm:$0xf] }
  0x6a   :  { %v3218_v63 = vld [vmem:[#allocation8 + $0x280] sm:$0xf]  ;;  %v3795_v1 = vor.u32 %v4212_v62, %v3794_v61  ;;  %2161 = vmatpush.bf16.msra.mxu0 %v2995_v55  ;;  %v3255_v55 = vor.u32 %v4072_v51, %v3252_v54  ;;  %v3156_v26 = vld [vmem:[#allocation8 + $0x220] sm:$0xf0]  ;;  %v163_v51 = vperm.slane %v4501_v44, 0 }
  0x6b   :  { %v4068_v0 = vld [vmem:[#allocation8 + $0x29c] sm:$0xf0]  ;;  %2174 = vmatpush.bf16.msra.mxu1 %v3251_v60  ;;  %v2932_v60 = vld [vmem:[#allocation8 + $0x60] sm:$0xf0]  ;;  %v3159_v28 = vor.u32 %v4048_v25, %v3156_v26  ;;  %v4109_v25 = vld [vmem:[#allocation8 + $0x3e4] sm:$0xf0] }
  0x6c   :  { %v2930_v4 = vld [vmem:[#allocation8 + $0x40] sm:$0xf]  ;;  %v3219_v6 = vor.u32 %v4068_v0, %v3218_v63  ;;  %2199 = vmatpush.bf16.msra.mxu3 %v3795_v1  ;;  %2187 = vmatpush.bf16.msra.mxu2 %v3507_v2  ;;  %v2935_v61 = vor.u32 %v3992_v58, %v2932_v60  ;;  %v4064_v0 = vld [vmem:[#allocation8 + $0x284] sm:$0xf] }
  0x6d   :  { %v3996_v5 = vld [vmem:[#allocation8 + $0x5c] sm:$0xf0]  ;;  %v3220_v2 = vld [vmem:[#allocation8 + $0x2a0] sm:$0xf0] }
  0x6e   :  { %v3186_v7 = vld [vmem:[#allocation8 + $0x240] sm:$0xf]  ;;  %2162 = vmatpush.bf16.msra.mxu0 %v2963_v3  ;;  %v2931_v9 = vor.u32 %v3996_v5, %v2930_v4  ;;  %v3223_v3 = vor.u32 %v4064_v0, %v3220_v2  ;;  %v3892_v29 = vld [vmem:[#allocation8 + $0x7e0] sm:$0xf0]  ;;  %v3130_v2 = vld [vmem:[#allocation8 + $0x1c8] sm:$0xf] }
  0x6f   :  { %v4060_v8 = vld [vmem:[#allocation8 + $0x25c] sm:$0xf0]  ;;  %2175 = vmatpush.bf16.msra.mxu1 %v3219_v6  ;;  %v4152_v31 = vld [vmem:[#allocation8 + $0x544] sm:$0xf] }
  0x70   :  { %v2898_v10 = vld [vmem:[#allocation8] sm:$0xf]  ;;  %v3187_v13 = vor.u32 %v4060_v8, %v3186_v7  ;;  %v3984_v7 = vld [vmem:[#allocation8 + $0x4] sm:$0xf] }
  0x71   :  { %v3988_v11 = vld [vmem:[#allocation8 + $0x1c] sm:$0xf0]  ;;  %v2900_v8 = vld [vmem:[#allocation8 + $0x20] sm:$0xf0] }
  0x72   :  { %v3154_v15 = vld [vmem:[#allocation8 + $0x200] sm:$0xf]  ;;  %2163 = vmatpush.bf16.msra.mxu0 %v2931_v9  ;;  %v2899_v19 = vor.u32 %v3988_v11, %v2898_v10  ;;  %v4168_v9 = vld [vmem:[#allocation8 + $0x5c4] sm:$0xf]  ;;  %v2903_v10 = vor.u32 %v3984_v7, %v2900_v8 }
  0x73   :  { %v4052_v16 = vld [vmem:[#allocation8 + $0x21c] sm:$0xf0]  ;;  %2176 = vmatpush.bf16.msra.mxu1 %v3187_v13  ;;  %v3636_v11 = vld [vmem:[#allocation8 + $0x5e0] sm:$0xf0] }
  0x74   :  { %v3155_v21 = vor.u32 %v4052_v16, %v3154_v15  ;;  %v3474_v42 = vld [vmem:[#allocation8 + $0x480] sm:$0xf]  ;;  %v3639_v12 = vor.u32 %v4168_v9, %v3636_v11  ;;  %v4056_v15 = vld [vmem:[#allocation8 + $0x244] sm:$0xf]  ;;  %v3098_v11 = vld [vmem:[#allocation8 + $0x188] sm:$0xf] }
  0x75   :  { %v4132_v43 = vld [vmem:[#allocation8 + $0x49c] sm:$0xf0]  ;;  %v3191_v18 = vor.u32 %v4056_v15, %v3188_v17  ;;  %v3572_v32 = vld [vmem:[#allocation8 + $0x560] sm:$0xf0] }
  0x76   :  { %2164 = vmatpush.bf16.msra.mxu0 %v2899_v19  ;;  %v3475_v45 = vor.u32 %v4132_v43, %v3474_v42  ;;  %v3762_v48 = vld [vmem:[#allocation8 + $0x6c0] sm:$0xf]  ;;  %v4160_v19 = vld [vmem:[#allocation8 + $0x584] sm:$0xf] }
  0x77   :  { %2177 = vmatpush.bf16.msra.mxu1 %v3155_v21  ;;  %v4204_v50 = vld [vmem:[#allocation8 + $0x6dc] sm:$0xf0]  ;;  %v4224_v34 = vld [vmem:[#allocation8 + $0x784] sm:$0xf] }
  0x78   :  { %2188 = vmatpush.bf16.msra.mxu2 %v3475_v45  ;;  %v3763_v52 = vor.u32 %v4204_v50, %v3762_v48  ;;  %v3442_v56 = vld [vmem:[#allocation8 + $0x440] sm:$0xf]  ;;  %v3860_v35 = vld [vmem:[#allocation8 + $0x7a0] sm:$0xf0] }
  0x79   :  { %v4124_v57 = vld [vmem:[#allocation8 + $0x45c] sm:$0xf0]  ;;  %v4144_v37 = vld [vmem:[#allocation8 + $0x504] sm:$0xf] }
  0x7a   :  { %2209 = vmatpush.bf16.msrb.mxu0 %v3127_v20  ;;  %2200 = vmatpush.bf16.msra.mxu3 %v3763_v52  ;;  %v3443_v59 = vor.u32 %v4124_v57, %v3442_v56  ;;  %v3730_v62 = vld [vmem:[#allocation8 + $0x680] sm:$0xf]  ;;  %v3604_v20 = vld [vmem:[#allocation8 + $0x5a0] sm:$0xf0] }
  0x7b   :  { %2222 = vmatpush.bf16.msrb.mxu1 %v3383_v24  ;;  %v4196_v63 = vld [vmem:[#allocation8 + $0x69c] sm:$0xf0]  ;;  %v3607_v21 = vor.u32 %v4160_v19, %v3604_v20  ;;  %v3540_v38 = vld [vmem:[#allocation8 + $0x520] sm:$0xf0] }
  0x7c   :  { %2189 = vmatpush.bf16.msra.mxu2 %v3443_v59  ;;  %v3731_v1 = vor.u32 %v4196_v63, %v3730_v62  ;;  %v3410_v4 = vld [vmem:[#allocation8 + $0x400] sm:$0xf]  ;;  %v4216_v39 = vld [vmem:[#allocation8 + $0x744] sm:$0xf] }
  0x7d   :  { %v4116_v5 = vld [vmem:[#allocation8 + $0x41c] sm:$0xf0]  ;;  %v3828_v40 = vld [vmem:[#allocation8 + $0x760] sm:$0xf0] }
  0x7e   :  { %2210 = vmatpush.bf16.msrb.mxu0 %v3095_v27  ;;  %2201 = vmatpush.bf16.msra.mxu3 %v3731_v1  ;;  %v3411_v6 = vor.u32 %v4116_v5, %v3410_v4  ;;  %v3698_v13 = vld [vmem:[#allocation8 + $0x640] sm:$0xf]  ;;  %v4232_v27 = vld [vmem:[#allocation8 + $0x7c4] sm:$0xf]  ;;  %v164_v5 = vperm.slane %v4501_v44, 1 }
  0x7f   :  { %2223 = vmatpush.bf16.msrb.mxu1 %v3351_v30  ;;  %v4188_v14 = vld [vmem:[#allocation8 + $0x65c] sm:$0xf0]  ;;  %v3895_v30 = vor.u32 %v4232_v27, %v3892_v29  ;;  %v3508_v42 = vld [vmem:[#allocation8 + $0x4e0] sm:$0xf0]  ;;  %v4029_v29 = vld [vmem:[#allocation8 + $0x164] sm:$0xf0] }
  0x80   :  { %2190 = vmatpush.bf16.msra.mxu2 %v3411_v6  ;;  %v3699_v16 = vor.u32 %v4188_v14, %v3698_v13  ;;  %v3666_v22 = vld [vmem:[#allocation8 + $0x600] sm:$0xf]  ;;  %v4208_v45 = vld [vmem:[#allocation8 + $0x704] sm:$0xf]  ;;  %v4037_v14 = vld [vmem:[#allocation8 + $0x1a4] sm:$0xf0] }
  0x81   :  { %v4180_v23 = vld [vmem:[#allocation8 + $0x61c] sm:$0xf0]  ;;  %v3796_v46 = vld [vmem:[#allocation8 + $0x720] sm:$0xf0] }
  0x82   :  { %2211 = vmatpush.bf16.msrb.mxu0 %v3063_v33  ;;  %2202 = vmatpush.bf16.msra.mxu3 %v3699_v16  ;;  %v3667_v24 = vor.u32 %v4180_v23, %v3666_v22  ;;  %v3575_v33 = vor.u32 %v4152_v31, %v3572_v32  ;;  %v4128_v48 = vld [vmem:[#allocation8 + $0x484] sm:$0xf] }
  0x83   :  { %2224 = vmatpush.bf16.msrb.mxu1 %v3319_v36  ;;  %v3863_v36 = vor.u32 %v4224_v34, %v3860_v35  ;;  %v3476_v50 = vld [vmem:[#allocation8 + $0x4a0] sm:$0xf0]  ;;  %v3354_v35 = vld [vmem:[#allocation8 + $0x388] sm:$0xf] }
  0x84   :  { %2235 = vmatpush.bf16.msrb.mxu2 %v3639_v12  ;;  %v3479_v52 = vor.u32 %v4128_v48, %v3476_v50  ;;  %v4200_v54 = vld [vmem:[#allocation8 + $0x6c4] sm:$0xf]  ;;  %v3290_v48 = vld [vmem:[#allocation8 + $0x308] sm:$0xf] }
  0x85   :  { %v4120_v58 = vld [vmem:[#allocation8 + $0x444] sm:$0xf]  ;;  %v4085_v50 = vld [vmem:[#allocation8 + $0x324] sm:$0xf0] }
  0x86   :  { %2212 = vmatpush.bf16.msrb.mxu0 %v3031_v49  ;;  %2203 = vmatpush.bf16.msra.mxu3 %v3667_v24  ;;  %v3543_v49 = vor.u32 %v4144_v37, %v3540_v38  ;;  %v3444_v59 = vld [vmem:[#allocation8 + $0x460] sm:$0xf0]  ;;  %v3099_v24 = vor.u32 %v4037_v14, %v3098_v11  ;;  %v3034_v38 = vld [vmem:[#allocation8 + $0x108] sm:$0xf]  ;;  %v166_v11 = vperm.slane %v4501_v44, 3 }
  0x87   :  { %2225 = vmatpush.bf16.msrb.mxu1 %v3287_v41  ;;  %v3831_v41 = vor.u32 %v4216_v39, %v3828_v40  ;;  %v3447_v62 = vor.u32 %v4120_v58, %v3444_v59  ;;  %v4192_v63 = vld [vmem:[#allocation8 + $0x684] sm:$0xf]  ;;  %v4077_v58 = vld [vmem:[#allocation8 + $0x2e4] sm:$0xf0] }
  0x88   :  { %2236 = vmatpush.bf16.msrb.mxu2 %v3607_v21  ;;  %v3732_v0 = vld [vmem:[#allocation8 + $0x6a0] sm:$0xf0]  ;;  %v3386_v21 = vld [vmem:[#allocation8 + $0x3c8] sm:$0xf] }
  0x89   :  { %v3735_v4 = vor.u32 %v4192_v63, %v3732_v0  ;;  %v4112_v6 = vld [vmem:[#allocation8 + $0x404] sm:$0xf]  ;;  %v3387_v32 = vor.u32 %v4109_v25, %v3386_v21  ;;  %v2938_v59 = vld [vmem:[#allocation8 + $0x48] sm:$0xf]  ;;  %v3100_v25 = vld [vmem:[#allocation8 + $0x1a8] sm:$0xf0] }
  0x8a   :  { %2213 = vmatpush.bf16.msrb.mxu0 %v2999_v53  ;;  %2248 = vmatpush.bf16.msrb.mxu3 %v3895_v30  ;;  %v4136_v53 = vld [vmem:[#allocation8 + $0x4c4] sm:$0xf] }
  0x8b   :  { %2226 = vmatpush.bf16.msrb.mxu1 %v3255_v55  ;;  %v3511_v43 = vor.u32 %v4136_v53, %v3508_v42  ;;  %v3764_v55 = vld [vmem:[#allocation8 + $0x6e0] sm:$0xf0]  ;;  %v3322_v53 = vld [vmem:[#allocation8 + $0x348] sm:$0xf] }
  0x8c   :  { %2237 = vmatpush.bf16.msrb.mxu2 %v3575_v33  ;;  %v3767_v56 = vor.u32 %v4200_v54, %v3764_v55  ;;  %v3412_v7 = vld [vmem:[#allocation8 + $0x420] sm:$0xf0]  ;;  %v4093_v42 = vld [vmem:[#allocation8 + $0x364] sm:$0xf0]  ;;  %v3291_v54 = vor.u32 %v4085_v50, %v3290_v48  ;;  %v165_v55 = vperm.slane %v4501_v44, 2 }
  0x8d   :  { %v3415_v9 = vor.u32 %v4112_v6, %v3412_v7  ;;  %v4184_v15 = vld [vmem:[#allocation8 + $0x644] sm:$0xf]  ;;  %v3642_v6 = vld [vmem:[#allocation8 + $0x5c8] sm:$0xf] }
  0x8e   :  { %2214 = vmatpush.bf16.msrb.mxu0 %v2967_v47  ;;  %2249 = vmatpush.bf16.msrb.mxu3 %v3863_v36  ;;  %v3799_v47 = vor.u32 %v4208_v45, %v3796_v46  ;;  %v3700_v16 = vld [vmem:[#allocation8 + $0x660] sm:$0xf0]  ;;  %v4101_v36 = vld [vmem:[#allocation8 + $0x3a4] sm:$0xf0]  ;;  %v3323_v46 = vor.u32 %v4093_v42, %v3322_v53  ;;  %v3068_v53 = vld [vmem:[#allocation8 + $0x168] sm:$0xf0] }
  0x8f   :  { %2227 = vmatpush.bf16.msrb.mxu1 %v3223_v3  ;;  %v4045_v3 = vld [vmem:[#allocation8 + $0x1e4] sm:$0xf0]  ;;  %v3703_v20 = vor.u32 %v4184_v15, %v3700_v16  ;;  %v4176_v26 = vld [vmem:[#allocation8 + $0x604] sm:$0xf]  ;;  %v3355_v40 = vor.u32 %v4101_v36, %v3354_v35 }
  0x90   :  { %2238 = vmatpush.bf16.msrb.mxu2 %v3543_v49  ;;  %v3668_v27 = vld [vmem:[#allocation8 + $0x620] sm:$0xf0]  ;;  %v4021_v49 = vld [vmem:[#allocation8 + $0x124] sm:$0xf0] }
  0x91   :  { %v3671_v30 = vor.u32 %v4176_v26, %v3668_v27  ;;  %v4013_v45 = vld [vmem:[#allocation8 + $0xe4] sm:$0xf0] }
  0x92   :  { %2215 = vmatpush.bf16.msrb.mxu0 %v2935_v61  ;;  %2250 = vmatpush.bf16.msrb.mxu3 %v3831_v41  ;;  %v3035_v41 = vor.u32 %v4021_v49, %v3034_v38  ;;  %v3194_v16 = vld [vmem:[#allocation8 + $0x248] sm:$0xf]  ;;  %v4105_v38 = vld [vmem:[#allocation8 + $0x3cc] sm:$0xf] }
  0x93   :  { %2228 = vmatpush.bf16.msrb.mxu1 %v3191_v18  ;;  %v3388_v49 = vld [vmem:[#allocation8 + $0x3e8] sm:$0xf0]  ;;  %v4229_v48 = vld [vmem:[#allocation8 + $0x7a4] sm:$0xf0] }
  0x94   :  { %2239 = vmatpush.bf16.msrb.mxu2 %v3511_v43  ;;  %v3002_v43 = vld [vmem:[#allocation8 + $0xc8] sm:$0xf] }
  0x96   :  { %2216 = vmatpush.bf16.msrb.mxu0 %v2903_v10  ;;  %2251 = vmatpush.bf16.msrb.mxu3 %v3799_v47  ;;  %v3131_v10 = vor.u32 %v4045_v3, %v3130_v2  ;;  %v3003_v47 = vor.u32 %v4013_v45, %v3002_v43  ;;  %v3226_v2 = vld [vmem:[#allocation8 + $0x288] sm:$0xf] }
  0x97   :  { %2229 = vmatpush.bf16.msrb.mxu1 %v3159_v28  ;;  %v3066_v28 = vld [vmem:[#allocation8 + $0x148] sm:$0xf] }
  0x98   :  { %2240 = vmatpush.bf16.msrb.mxu2 %v3479_v52  ;;  %v3067_v34 = vor.u32 %v4029_v29, %v3066_v28  ;;  %v4005_v52 = vld [vmem:[#allocation8 + $0xa4] sm:$0xf0] }
  0x99   :  { %v4069_v3 = vld [vmem:[#allocation8 + $0x2a4] sm:$0xf0] }
  0x9a   :  { %2252 = vmatpush.bf16.msrb.mxu3 %v3767_v56  ;;  %v3162_v29 = vld [vmem:[#allocation8 + $0x208] sm:$0xf] }
  0x9c   :  { %2241 = vmatpush.bf16.msrb.mxu2 %v3447_v62 }
  0x9e   :  { %2253 = vmatpush.bf16.msrb.mxu3 %v3735_v4  ;;  %v2906_v4 = vld [vmem:[#allocation8 + $0x8] sm:$0xf] }
  0xa0   :  { %2242 = vmatpush.bf16.msrb.mxu2 %v3415_v9  ;;  %v4041_v9 = vld [vmem:[#allocation8 + $0x1cc] sm:$0xf] }
  0xa2   :  { %2254 = vmatpush.bf16.msrb.mxu3 %v3703_v20  ;;  %v3610_v20 = vld [vmem:[#allocation8 + $0x588] sm:$0xf] }
  0xa6   :  { %2255 = vmatpush.bf16.msrb.mxu3 %v3671_v30 }
  0xb6   :  { %v500_v57 = vpop.f32.mrf.mxu0 }
  0xb7   :  { %v501_v60 = vadd.f32 %v500_v57, %v163_v51  ;;  %v513_v61 = vpop.f32.mrf.mxu1  ;;  %v2970_v51 = vld [vmem:[#allocation8 + $0x88] sm:$0xf] }
  0xb8   :  { %v2971_v56 = vor.u32 %v4005_v52, %v2970_v51  ;;  %v3258_v57 = vld [vmem:[#allocation8 + $0x2c8] sm:$0xf] }
  0xb9   :  { %v514_v1 = vadd.f32 %v513_v61, %v501_v60  ;;  %v3997_v60 = vld [vmem:[#allocation8 + $0x64] sm:$0xf0]  ;;  %v3259_v62 = vor.u32 %v4077_v58, %v3258_v57 }
  0xba   :  { %v4149_v58 = vld [vmem:[#allocation8 + $0x524] sm:$0xf0] }
  0xbb   :  { %v595_v8 = vmax.f32 %v514_v1, 0.0  ;;  %v2939_v1 = vor.u32 %v3997_v60, %v2938_v59  ;;  %v4017_v59 = vld [vmem:[#allocation8 + $0x10c] sm:$0xf] }
  0xbc   :  { %v3036_v60 = vld [vmem:[#allocation8 + $0x128] sm:$0xf0] }
  0xbd   :  { %v4505_v12 = vpack.c.bf16 %v595_v8, %v595_v8  ;;  %v4173_v8 = vld [vmem:[#allocation8 + $0x5e4] sm:$0xf0] }
  0xbe   :  { %v526_v13 = vpop.f32.mrf.mxu2  ;;  %v502_v19 = vpop.f32.mrf.mxu0 }
  0xbf   :  { %v527_v17 = vadd.f32 %v526_v13, %v164_v5  ;;  %v539_v18 = vpop.f32.mrf.mxu3  ;;  %2165 = vmatmul.bf16.vlgmr.msra.gmra.mxu0 %v4505_v12  ;;  %v515_v22 = vpop.f32.mrf.mxu1  ;;  %v3989_v5 = vld [vmem:[#allocation8 + $0x24] sm:$0xf0]  ;;  %v3227_v13 = vor.u32 %v4069_v3, %v3226_v2  ;;  %v3039_v2 = vor.u32 %v4017_v59, %v3036_v60  ;;  %v4057_v59 = vld [vmem:[#allocation8 + $0x24c] sm:$0xf] }
  0xc0   :  { %2261 = vmatpush.bf16.msra.mxu0 %v3131_v10  ;;  %v3132_v10 = vld [vmem:[#allocation8 + $0x1e8] sm:$0xf0]  ;;  %v2907_v15 = vor.u32 %v3989_v5, %v2906_v4  ;;  %v4221_v3 = vld [vmem:[#allocation8 + $0x764] sm:$0xf0] }
  0xc1   :  { %v540_v23 = vadd.f32 %v539_v18, %v527_v17  ;;  %v4061_v17 = vld [vmem:[#allocation8 + $0x264] sm:$0xf0]  ;;  %v3643_v18 = vor.u32 %v4173_v8, %v3642_v6  ;;  %v3135_v19 = vor.u32 %v4041_v9, %v3132_v10  ;;  %v4089_v4 = vld [vmem:[#allocation8 + $0x34c] sm:$0xf] }
  0xc2   :  { %v3195_v44 = vor.u32 %v4061_v17, %v3194_v16  ;;  %v3324_v5 = vld [vmem:[#allocation8 + $0x368] sm:$0xf0]  ;;  %v3514_v8 = vld [vmem:[#allocation8 + $0x4c8] sm:$0xf] }
  0xc3   :  { %v596_v31 = vmax.f32 %v540_v23, 0.0  ;;  %v4165_v23 = vld [vmem:[#allocation8 + $0x5a4] sm:$0xf0]  ;;  %v4009_v6 = vld [vmem:[#allocation8 + $0xcc] sm:$0xf] }
  0xc4   :  { %2262 = vmatpush.bf16.msra.mxu0 %v3099_v24  ;;  %v4033_v24 = vld [vmem:[#allocation8 + $0x18c] sm:$0xf]  ;;  %v3611_v36 = vor.u32 %v4165_v23, %v3610_v20  ;;  %v4141_v9 = vld [vmem:[#allocation8 + $0x4e4] sm:$0xf0] }
  0xc5   :  { %v4508_v33 = vpack.c.bf16 %v596_v31, %v596_v31  ;;  %v4053_v31 = vld [vmem:[#allocation8 + $0x224] sm:$0xf0]  ;;  %v4081_v16 = vld [vmem:[#allocation8 + $0x30c] sm:$0xf] }
  0xc6   :  { %v528_v37 = vpop.f32.mrf.mxu2  ;;  %v3163_v43 = vor.u32 %v4053_v31, %v3162_v29  ;;  %v3292_v17 = vld [vmem:[#allocation8 + $0x328] sm:$0xf0]  ;;  %v4133_v23 = vld [vmem:[#allocation8 + $0x4a4] sm:$0xf0] }
  0xc7   :  { %2178 = vmatmul.bf16.vlgmr.msra.gmra.mxu1 %v4508_v33  ;;  %v541_v39 = vpop.f32.mrf.mxu3  ;;  %v3103_v37 = vor.u32 %v4033_v24, %v3100_v25  ;;  %v2972_v20 = vld [vmem:[#allocation8 + $0xa8] sm:$0xf0]  ;;  %v3295_v25 = vor.u32 %v4081_v16, %v3292_v17  ;;  %v3074_v17 = vld [vmem:[#allocation8 + $0x150] sm:$0xf] }
  0xc8   :  { %2274 = vmatpush.bf16.msra.mxu1 %v3387_v32  ;;  %2263 = vmatpush.bf16.msra.mxu0 %v3067_v34  ;;  %v3898_v32 = vld [vmem:[#allocation8 + $0x7c8] sm:$0xf]  ;;  %v3260_v29 = vld [vmem:[#allocation8 + $0x2e8] sm:$0xf0] }
  0xc9   :  { %v4237_v34 = vld [vmem:[#allocation8 + $0x7e4] sm:$0xf0]  ;;  %v3993_v31 = vld [vmem:[#allocation8 + $0x4c] sm:$0xf] }
  0xca   :  { %v3578_v39 = vld [vmem:[#allocation8 + $0x548] sm:$0xf]  ;;  %v3899_v45 = vor.u32 %v4237_v34, %v3898_v32  ;;  %v2940_v32 = vld [vmem:[#allocation8 + $0x68] sm:$0xf0] }
  0xcb   :  { %v3450_v34 = vld [vmem:[#allocation8 + $0x448] sm:$0xf]  ;;  %v3196_v60 = vld [vmem:[#allocation8 + $0x268] sm:$0xf0] }
  0xcc   :  { %2275 = vmatpush.bf16.msra.mxu1 %v3355_v40  ;;  %2264 = vmatpush.bf16.msra.mxu0 %v3035_v41  ;;  %v4157_v40 = vld [vmem:[#allocation8 + $0x564] sm:$0xf0]  ;;  %v4025_v41 = vld [vmem:[#allocation8 + $0x14c] sm:$0xf] }
  0xcd   :  { %v3579_v51 = vor.u32 %v4157_v40, %v3578_v39  ;;  %v3071_v52 = vor.u32 %v4025_v41, %v3068_v53  ;;  %v4197_v39 = vld [vmem:[#allocation8 + $0x6a4] sm:$0xf0]  ;;  %v4065_v40 = vld [vmem:[#allocation8 + $0x28c] sm:$0xf] }
  0xce   :  { %v3228_v41 = vld [vmem:[#allocation8 + $0x2a8] sm:$0xf0] }
  0xcf   :  { %2217 = vmatmul.bf16.vlgmr.msrb.gmra.mxu0 %v4505_v12 }
  0xd0   :  { %2276 = vmatpush.bf16.msra.mxu1 %v3323_v46  ;;  %2265 = vmatpush.bf16.msra.mxu0 %v3003_v47  ;;  %v3391_v46 = vor.u32 %v4105_v38, %v3388_v49  ;;  %v3866_v47 = vld [vmem:[#allocation8 + $0x788] sm:$0xf]  ;;  %v2943_v49 = vor.u32 %v3993_v31, %v2940_v32  ;;  %v3042_v31 = vld [vmem:[#allocation8 + $0x110] sm:$0xf] }
  0xd1   :  { %v3738_v38 = vld [vmem:[#allocation8 + $0x688] sm:$0xf]  ;;  %v4022_v32 = vld [vmem:[#allocation8 + $0x12c] sm:$0xf0] }
  0xd4   :  { %2277 = vmatpush.bf16.msra.mxu1 %v3291_v54  ;;  %2266 = vmatpush.bf16.msra.mxu0 %v2971_v56  ;;  %v4097_v54 = vld [vmem:[#allocation8 + $0x38c] sm:$0xf]  ;;  %v3546_v56 = vld [vmem:[#allocation8 + $0x508] sm:$0xf] }
  0xd6   :  { %v552_v61 = vpop.f32.mrf.mxu0 }
  0xd7   :  { %v553_v63 = vadd.f32 %v552_v61, %v165_v55  ;;  %v565_v0 = vpop.f32.mrf.mxu1  ;;  %2230 = vmatmul.bf16.vlgmr.msrb.gmra.mxu1 %v4508_v33  ;;  %v3356_v55 = vld [vmem:[#allocation8 + $0x3a8] sm:$0xf0] }
  0xd8   :  { %2278 = vmatpush.bf16.msra.mxu1 %v3259_v62  ;;  %2267 = vmatpush.bf16.msra.mxu0 %v2939_v1  ;;  %v3867_v62 = vor.u32 %v4229_v48, %v3866_v47  ;;  %v3547_v1 = vor.u32 %v4149_v58, %v3546_v56  ;;  %v3138_v47 = vld [vmem:[#allocation8 + $0x1d0] sm:$0xf]  ;;  %v3706_v56 = vld [vmem:[#allocation8 + $0x648] sm:$0xf] }
  0xd9   :  { %v566_v7 = vadd.f32 %v565_v0, %v553_v63  ;;  %v3359_v63 = vor.u32 %v4097_v54, %v3356_v55  ;;  %v3834_v0 = vld [vmem:[#allocation8 + $0x748] sm:$0xf]  ;;  %v4046_v48 = vld [vmem:[#allocation8 + $0x1ec] sm:$0xf0]  ;;  %v4169_v54 = vld [vmem:[#allocation8 + $0x5cc] sm:$0xf] }
  0xda   :  { %v3835_v10 = vor.u32 %v4221_v3, %v3834_v0  ;;  %v3644_v55 = vld [vmem:[#allocation8 + $0x5e8] sm:$0xf0]  ;;  %v4189_v58 = vld [vmem:[#allocation8 + $0x664] sm:$0xf0] }
  0xdb   :  { %v597_v14 = vmax.f32 %v566_v7, 0.0  ;;  %v3004_v7 = vld [vmem:[#allocation8 + $0xe8] sm:$0xf0]  ;;  %v3707_v3 = vor.u32 %v4189_v58, %v3706_v56  ;;  %v4086_v56 = vld [vmem:[#allocation8 + $0x32c] sm:$0xf0] }
  0xdc   :  { %2279 = vmatpush.bf16.msra.mxu1 %v3227_v13  ;;  %2268 = vmatpush.bf16.msra.mxu0 %v2907_v15  ;;  %v3802_v13 = vld [vmem:[#allocation8 + $0x708] sm:$0xf]  ;;  %v4161_v0 = vld [vmem:[#allocation8 + $0x58c] sm:$0xf]  ;;  %v2978_v58 = vld [vmem:[#allocation8 + $0x90] sm:$0xf] }
  0xdd   :  { %v4515_v21 = vpack.c.bf16 %v597_v14, %v597_v14  ;;  %v3007_v14 = vor.u32 %v4009_v6, %v3004_v7  ;;  %v4213_v15 = vld [vmem:[#allocation8 + $0x724] sm:$0xf0] }
  0xde   :  { %v578_v22 = vpop.f32.mrf.mxu2  ;;  %v554_v28 = vpop.f32.mrf.mxu0  ;;  %v3803_v24 = vor.u32 %v4213_v15, %v3802_v13  ;;  %v3674_v6 = vld [vmem:[#allocation8 + $0x608] sm:$0xf]  ;;  %v3900_v13 = vld [vmem:[#allocation8 + $0x7e8] sm:$0xf0]  ;;  %v4110_v15 = vld [vmem:[#allocation8 + $0x3ec] sm:$0xf0] }
  0xdf   :  { %v579_v26 = vadd.f32 %v578_v22, %v166_v11  ;;  %v591_v27 = vpop.f32.mrf.mxu3  ;;  %v567_v30 = vpop.f32.mrf.mxu1  ;;  %2191 = vmatmul.bf16.vlgmr.msra.gmra.mxu2 %v4515_v21  ;;  %2269 = vmatmul.bf16.vlgmr.msra.gmra.mxu0 %v4505_v12  ;;  %v3327_v11 = vor.u32 %v4089_v4, %v3324_v5  ;;  %v3482_v22 = vld [vmem:[#allocation8 + $0x488] sm:$0xf]  ;;  %v3199_v4 = vor.u32 %v4057_v59, %v3196_v60  ;;  %v3612_v5 = vld [vmem:[#allocation8 + $0x5a8] sm:$0xf0]  ;;  %v4006_v59 = vld [vmem:[#allocation8 + $0xac] sm:$0xf0] }
  0xe0   :  { %2287 = vmatpush.bf16.msra.mxu2 %v3643_v18  ;;  %2313 = vmatpush.bf16.msrb.mxu0 %v3135_v19  ;;  %v3515_v18 = vor.u32 %v4141_v9, %v3514_v8  ;;  %v4001_v19 = vld [vmem:[#allocation8 + $0x8c] sm:$0xf]  ;;  %v4205_v28 = vld [vmem:[#allocation8 + $0x6e4] sm:$0xf0]  ;;  %v3483_v30 = vor.u32 %v4133_v23, %v3482_v22  ;;  %v3615_v16 = vor.u32 %v4161_v0, %v3612_v5 }
  0xe1   :  { %v592_v35 = vadd.f32 %v591_v27, %v579_v26  ;;  %2280 = vmatpush.bf16.msra.mxu1 %v3195_v44  ;;  %v3770_v26 = vld [vmem:[#allocation8 + $0x6c8] sm:$0xf]  ;;  %v2975_v27 = vor.u32 %v4001_v19, %v2972_v20  ;;  %v4073_v44 = vld [vmem:[#allocation8 + $0x2cc] sm:$0xf] }
  0xe2   :  { %v4181_v7 = vld [vmem:[#allocation8 + $0x624] sm:$0xf0]  ;;  %v4049_v8 = vld [vmem:[#allocation8 + $0x20c] sm:$0xf] }
  0xe3   :  { %v598_v42 = vmax.f32 %v592_v35, 0.0  ;;  %v4125_v35 = vld [vmem:[#allocation8 + $0x464] sm:$0xf0]  ;;  %v3164_v9 = vld [vmem:[#allocation8 + $0x228] sm:$0xf0]  ;;  %v3675_v19 = vor.u32 %v4181_v7, %v3674_v6 }
  0xe4   :  { %2288 = vmatpush.bf16.msra.mxu2 %v3611_v36  ;;  %2314 = vmatpush.bf16.msrb.mxu0 %v3103_v37  ;;  %v3771_v36 = vor.u32 %v4205_v28, %v3770_v26  ;;  %v3263_v37 = vor.u32 %v4073_v44, %v3260_v29  ;;  %v3451_v53 = vor.u32 %v4125_v35, %v3450_v34  ;;  %v4153_v22 = vld [vmem:[#allocation8 + $0x54c] sm:$0xf]  ;;  %v3362_v44 = vld [vmem:[#allocation8 + $0x390] sm:$0xf] }
  0xe5   :  { %v4519_v50 = vpack.c.bf16 %v598_v42, %v598_v42  ;;  %2281 = vmatpush.bf16.msra.mxu1 %v3163_v43  ;;  %v3418_v42 = vld [vmem:[#allocation8 + $0x408] sm:$0xf]  ;;  %v3985_v43 = vld [vmem:[#allocation8 + $0xc] sm:$0xf]  ;;  %v3167_v20 = vor.u32 %v4049_v8, %v3164_v9  ;;  %v4102_v29 = vld [vmem:[#allocation8 + $0x3ac] sm:$0xf0] }
  0xe6   :  { %v580_v57 = vpop.f32.mrf.mxu2  ;;  %v3580_v23 = vld [vmem:[#allocation8 + $0x568] sm:$0xf0]  ;;  %v2946_v6 = vld [vmem:[#allocation8 + $0x50] sm:$0xf] }
  0xe7   :  { %v593_v61 = vpop.f32.mrf.mxu3  ;;  %2204 = vmatmul.bf16.vlgmr.msra.gmra.mxu3 %v4519_v50  ;;  %v4225_v26 = vld [vmem:[#allocation8 + $0x78c] sm:$0xf]  ;;  %v3998_v7 = vld [vmem:[#allocation8 + $0x6c] sm:$0xf0] }
  0xe8   :  { %2300 = vmatpush.bf16.msra.mxu3 %v3899_v45  ;;  %2289 = vmatpush.bf16.msra.mxu2 %v3579_v51  ;;  %v2908_v45 = vld [vmem:[#allocation8 + $0x28] sm:$0xf0]  ;;  %v3739_v51 = vor.u32 %v4197_v39, %v3738_v38 }
  0xe9   :  { %2326 = vmatpush.bf16.msrb.mxu1 %v3391_v46  ;;  %2315 = vmatpush.bf16.msrb.mxu0 %v3071_v52  ;;  %v4117_v46 = vld [vmem:[#allocation8 + $0x424] sm:$0xf0]  ;;  %v3231_v52 = vor.u32 %v4065_v40, %v3228_v41  ;;  %v2911_v57 = vor.u32 %v3985_v43, %v2908_v45  ;;  %v3868_v28 = vld [vmem:[#allocation8 + $0x7a8] sm:$0xf0]  ;;  %v3330_v40 = vld [vmem:[#allocation8 + $0x350] sm:$0xf] }
  0xea   :  { %2282 = vmatmul.bf16.vlgmr.msra.gmra.mxu1 %v4508_v33  ;;  %v3419_v61 = vor.u32 %v4117_v46, %v3418_v42  ;;  %v4145_v34 = vld [vmem:[#allocation8 + $0x50c] sm:$0xf]  ;;  %v4094_v41 = vld [vmem:[#allocation8 + $0x36c] sm:$0xf0] }
  0xeb   :  { %v3548_v35 = vld [vmem:[#allocation8 + $0x528] sm:$0xf0]  ;;  %v3010_v42 = vld [vmem:[#allocation8 + $0xd0] sm:$0xf] }
  0xec   :  { %2301 = vmatpush.bf16.msra.mxu3 %v3867_v62  ;;  %2290 = vmatpush.bf16.msra.mxu2 %v3547_v1  ;;  %v3139_v62 = vor.u32 %v4046_v48, %v3138_v47  ;;  %v3106_v1 = vld [vmem:[#allocation8 + $0x190] sm:$0xf]  ;;  %v4217_v38 = vld [vmem:[#allocation8 + $0x74c] sm:$0xf]  ;;  %v3331_v48 = vor.u32 %v4094_v41, %v3330_v40 }
  0xed   :  { %2327 = vmatpush.bf16.msrb.mxu1 %v3359_v63  ;;  %2316 = vmatpush.bf16.msrb.mxu0 %v3039_v2  ;;  %v3647_v63 = vor.u32 %v4169_v54, %v3644_v55  ;;  %v4038_v2 = vld [vmem:[#allocation8 + $0x1ac] sm:$0xf0]  ;;  %v3836_v39 = vld [vmem:[#allocation8 + $0x768] sm:$0xf0] }
  0xee   :  { %v4014_v43 = vld [vmem:[#allocation8 + $0xec] sm:$0xf0]  ;;  %v4137_v45 = vld [vmem:[#allocation8 + $0x4cc] sm:$0xf]  ;;  %v3839_v47 = vor.u32 %v4217_v38, %v3836_v39  ;;  %v3108_v39 = vld [vmem:[#allocation8 + $0x1b0] sm:$0xf0] }
  0xef   :  { %2243 = vmatmul.bf16.vlgmr.msrb.gmra.mxu2 %v4515_v21  ;;  %v3516_v46 = vld [vmem:[#allocation8 + $0x4e8] sm:$0xf0]  ;;  %v3298_v55 = vld [vmem:[#allocation8 + $0x310] sm:$0xf] }
  0xf0   :  { %2302 = vmatpush.bf16.msra.mxu3 %v3835_v10  ;;  %2291 = vmatpush.bf16.msra.mxu2 %v3515_v18  ;;  %v4233_v10 = vld [vmem:[#allocation8 + $0x7cc] sm:$0xf]  ;;  %v4030_v18 = vld [vmem:[#allocation8 + $0x16c] sm:$0xf0] }
  0xf1   :  { %2328 = vmatpush.bf16.msrb.mxu1 %v3327_v11  ;;  %2317 = vmatpush.bf16.msrb.mxu0 %v3007_v14  ;;  %v3107_v11 = vor.u32 %v4038_v2, %v3106_v1  ;;  %v3394_v14 = vld [vmem:[#allocation8 + $0x3d0] sm:$0xf]  ;;  %v3804_v54 = vld [vmem:[#allocation8 + $0x728] sm:$0xf0]  ;;  %v2979_v1 = vor.u32 %v4006_v59, %v2978_v58 }
  0xf2   :  { %v4129_v60 = vld [vmem:[#allocation8 + $0x48c] sm:$0xf]  ;;  %v3618_v38 = vld [vmem:[#allocation8 + $0x590] sm:$0xf] }
  0xf3   :  { %v4201_v0 = vld [vmem:[#allocation8 + $0x6cc] sm:$0xf] }
  0xf4   :  { %2303 = vmatpush.bf16.msra.mxu3 %v3803_v24  ;;  %2292 = vmatpush.bf16.msra.mxu2 %v3483_v30  ;;  %v3903_v24 = vor.u32 %v4233_v10, %v3900_v13  ;;  %v3583_v30 = vor.u32 %v4153_v22, %v3580_v23  ;;  %v3772_v2 = vld [vmem:[#allocation8 + $0x6e8] sm:$0xf0]  ;;  %v3990_v22 = vld [vmem:[#allocation8 + $0x2c] sm:$0xf0] }
  0xf5   :  { %2329 = vmatpush.bf16.msrb.mxu1 %v3295_v25  ;;  %2318 = vmatpush.bf16.msrb.mxu0 %v2975_v27  ;;  %v3395_v25 = vor.u32 %v4110_v15, %v3394_v14  ;;  %v3075_v27 = vor.u32 %v4030_v18, %v3074_v17  ;;  %v4121_v8 = vld [vmem:[#allocation8 + $0x44c] sm:$0xf]  ;;  %v3775_v10 = vor.u32 %v4201_v0, %v3772_v2  ;;  %v4070_v17 = vld [vmem:[#allocation8 + $0x2ac] sm:$0xf0] }
  0xf6   :  { %v3452_v9 = vld [vmem:[#allocation8 + $0x468] sm:$0xf0]  ;;  %v2947_v14 = vor.u32 %v3998_v7, %v2946_v6  ;;  %v3874_v0 = vld [vmem:[#allocation8 + $0x790] sm:$0xf]  ;;  %v3044_v6 = vld [vmem:[#allocation8 + $0x130] sm:$0xf0] }
  0xf7   :  { %2256 = vmatmul.bf16.vlgmr.msrb.gmra.mxu3 %v4519_v50  ;;  %v4193_v13 = vld [vmem:[#allocation8 + $0x68c] sm:$0xf]  ;;  %v3455_v18 = vor.u32 %v4121_v8, %v3452_v9  ;;  %v4230_v2 = vld [vmem:[#allocation8 + $0x7ac] sm:$0xf0] }
  0xf8   :  { %2304 = vmatpush.bf16.msra.mxu3 %v3771_v36  ;;  %2293 = vmatpush.bf16.msra.mxu2 %v3451_v53  ;;  %v3871_v36 = vor.u32 %v4225_v26, %v3868_v28  ;;  %v3551_v53 = vor.u32 %v4145_v34, %v3548_v35  ;;  %v3740_v15 = vld [vmem:[#allocation8 + $0x6a8] sm:$0xf0]  ;;  %v3650_v28 = vld [vmem:[#allocation8 + $0x5d0] sm:$0xf]  ;;  %v3875_v8 = vor.u32 %v4230_v2, %v3874_v0  ;;  %v4170_v2 = vld [vmem:[#allocation8 + $0x5d4] sm:$0xf] }
  0xf9   :  { %2330 = vmatpush.bf16.msrb.mxu1 %v3263_v37  ;;  %2319 = vmatpush.bf16.msrb.mxu0 %v2943_v49  ;;  %v3363_v37 = vor.u32 %v4102_v29, %v3362_v44  ;;  %v3043_v49 = vor.u32 %v4022_v32, %v3042_v31  ;;  %v3420_v23 = vld [vmem:[#allocation8 + $0x428] sm:$0xf0]  ;;  %v3743_v26 = vor.u32 %v4193_v13, %v3740_v15  ;;  %v4174_v44 = vld [vmem:[#allocation8 + $0x5ec] sm:$0xf0] }
  0xfa   :  { %v4185_v29 = vld [vmem:[#allocation8 + $0x64c] sm:$0xf]  ;;  %v3202_v32 = vld [vmem:[#allocation8 + $0x250] sm:$0xf] }
  0xfb   :  { %v3708_v31 = vld [vmem:[#allocation8 + $0x668] sm:$0xf0]  ;;  %v4062_v34 = vld [vmem:[#allocation8 + $0x26c] sm:$0xf0] }
  0xfc   :  { %2305 = vmatpush.bf16.msra.mxu3 %v3739_v51  ;;  %2294 = vmatpush.bf16.msra.mxu2 %v3419_v61  ;;  %v4209_v51 = vld [vmem:[#allocation8 + $0x70c] sm:$0xf]  ;;  %v3711_v40 = vor.u32 %v4185_v29, %v3708_v31  ;;  %v3203_v41 = vor.u32 %v4062_v34, %v3202_v32  ;;  %v3842_v13 = vld [vmem:[#allocation8 + $0x750] sm:$0xf]  ;;  %v3300_v29 = vld [vmem:[#allocation8 + $0x330] sm:$0xf0] }
  0xfd   :  { %2331 = vmatpush.bf16.msrb.mxu1 %v3231_v52  ;;  %2320 = vmatpush.bf16.msrb.mxu0 %v2911_v57  ;;  %v3011_v52 = vor.u32 %v4014_v43, %v3010_v42  ;;  %v3519_v57 = vor.u32 %v4137_v45, %v3516_v46  ;;  %v3484_v61 = vld [vmem:[#allocation8 + $0x4a8] sm:$0xf0]  ;;  %v3170_v45 = vld [vmem:[#allocation8 + $0x210] sm:$0xf]  ;;  %v2980_v31 = vld [vmem:[#allocation8 + $0xb0] sm:$0xf0] }
  0xfe   :  { %v3487_v5 = vor.u32 %v4129_v60, %v3484_v61  ;;  %v4177_v42 = vld [vmem:[#allocation8 + $0x60c] sm:$0xf]  ;;  %v4054_v46 = vld [vmem:[#allocation8 + $0x22c] sm:$0xf0] }
  0xff   :  { %2295 = vmatmul.bf16.vlgmr.msra.gmra.mxu2 %v4515_v21  ;;  %v3676_v43 = vld [vmem:[#allocation8 + $0x628] sm:$0xf0]  ;;  %v3171_v59 = vor.u32 %v4054_v46, %v3170_v45  ;;  %v4222_v15 = vld [vmem:[#allocation8 + $0x76c] sm:$0xf0] }
 0x100   :  { %2339 = vmatpush.bf16.msrb.mxu2 %v3647_v63  ;;  %2306 = vmatpush.bf16.msra.mxu3 %v3707_v3  ;;  %v3299_v63 = vor.u32 %v4086_v56, %v3298_v55  ;;  %v3266_v3 = vld [vmem:[#allocation8 + $0x2d0] sm:$0xf]  ;;  %v4026_v56 = vld [vmem:[#allocation8 + $0x154] sm:$0xf]  ;;  %v3679_v58 = vor.u32 %v4177_v42, %v3676_v43 }
 0x101   :  { %2365 = vmatpush.bf16.msra.mxu0 %v3139_v62  ;;  %2332 = vmatpush.bf16.msrb.mxu1 %v3199_v4  ;;  %v3807_v62 = vor.u32 %v4209_v51, %v3804_v54  ;;  %v4078_v4 = vld [vmem:[#allocation8 + $0x2ec] sm:$0xf0]  ;;  %v3396_v54 = vld [vmem:[#allocation8 + $0x3f0] sm:$0xf0] }
 0x102   :  { %2321 = vmatmul.bf16.vlgmr.msrb.gmra.mxu0 %v4505_v12  ;;  %v4238_v51 = vld [vmem:[#allocation8 + $0x7ec] sm:$0xf0]  ;;  %v2948_v42 = vld [vmem:[#allocation8 + $0x70] sm:$0xf0] }
 0x103   :  { %v3426_v0 = vld [vmem:[#allocation8 + $0x410] sm:$0xf] }
 0x104   :  { %2340 = vmatpush.bf16.msrb.mxu2 %v3615_v16  ;;  %2307 = vmatpush.bf16.msra.mxu3 %v3675_v19  ;;  %v3234_v16 = vld [vmem:[#allocation8 + $0x290] sm:$0xf]  ;;  %v4113_v19 = vld [vmem:[#allocation8 + $0x40c] sm:$0xf] }
 0x105   :  { %2366 = vmatpush.bf16.msra.mxu0 %v3107_v11  ;;  %2333 = vmatpush.bf16.msrb.mxu1 %v3167_v20  ;;  %v3267_v11 = vor.u32 %v4078_v4, %v3266_v3  ;;  %v2914_v20 = vld [vmem:[#allocation8 + $0x10] sm:$0xf]  ;;  %v3423_v35 = vor.u32 %v4113_v19, %v3420_v23  ;;  %v4098_v3 = vld [vmem:[#allocation8 + $0x394] sm:$0xf] }
 0x106   :  { %v3364_v4 = vld [vmem:[#allocation8 + $0x3b0] sm:$0xf0] }
 0x107   :  { %2308 = vmatmul.bf16.vlgmr.msra.gmra.mxu3 %v4519_v50  ;;  %v3367_v9 = vor.u32 %v4098_v3, %v3364_v4  ;;  %v3012_v19 = vld [vmem:[#allocation8 + $0xf0] sm:$0xf0] }
 0x108   :  { %2352 = vmatpush.bf16.msrb.mxu3 %v3903_v24  ;;  %2334 = vmatmul.bf16.vlgmr.msrb.gmra.mxu1 %v4508_v33  ;;  %v4042_v24 = vld [vmem:[#allocation8 + $0x1d4] sm:$0xf] }
 0x109   :  { %2378 = vmatpush.bf16.msra.mxu1 %v3395_v25  ;;  %2367 = vmatpush.bf16.msra.mxu0 %v3075_v27  ;;  %v3140_v25 = vld [vmem:[#allocation8 + $0x1f0] sm:$0xf0]  ;;  %v3235_v27 = vor.u32 %v4070_v17, %v3234_v16 }
 0x10a   :  { %2341 = vmatpush.bf16.msrb.mxu2 %v3583_v30  ;;  %v2915_v30 = vor.u32 %v3990_v22, %v2914_v20  ;;  %v4090_v16 = vld [vmem:[#allocation8 + $0x354] sm:$0xf]  ;;  %v3843_v22 = vor.u32 %v4222_v15, %v3842_v13  ;;  %v4039_v13 = vld [vmem:[#allocation8 + $0x1b4] sm:$0xf0] }
 0x10b   :  { %v3332_v17 = vld [vmem:[#allocation8 + $0x370] sm:$0xf0] }
 0x10c   :  { %2353 = vmatpush.bf16.msrb.mxu3 %v3871_v36  ;;  %v3143_v36 = vor.u32 %v4042_v24, %v3140_v25  ;;  %v3335_v23 = vor.u32 %v4090_v16, %v3332_v17  ;;  %v3522_v24 = vld [vmem:[#allocation8 + $0x4d0] sm:$0xf]  ;;  %v3652_v4 = vld [vmem:[#allocation8 + $0x5f0] sm:$0xf0] }
 0x10d   :  { %2379 = vmatpush.bf16.msra.mxu1 %v3363_v37  ;;  %2368 = vmatpush.bf16.msra.mxu0 %v3043_v49  ;;  %v3651_v37 = vor.u32 %v4174_v44, %v3650_v28  ;;  %v4034_v49 = vld [vmem:[#allocation8 + $0x194] sm:$0xf]  ;;  %v4142_v25 = vld [vmem:[#allocation8 + $0x4ec] sm:$0xf0] }
 0x10e   :  { %2342 = vmatpush.bf16.msrb.mxu2 %v3551_v53  ;;  %v4166_v53 = vld [vmem:[#allocation8 + $0x5ac] sm:$0xf0]  ;;  %v4082_v44 = vld [vmem:[#allocation8 + $0x314] sm:$0xf]  ;;  %v3523_v32 = vor.u32 %v4142_v25, %v3522_v24 }
 0x10f   :  { %v3619_v55 = vor.u32 %v4166_v53, %v3618_v38  ;;  %v4214_v28 = vld [vmem:[#allocation8 + $0x72c] sm:$0xf0]  ;;  %v3994_v53 = vld [vmem:[#allocation8 + $0x54] sm:$0xf] }
 0x110   :  { %2354 = vmatpush.bf16.msrb.mxu3 %v3839_v47  ;;  %v3906_v47 = vld [vmem:[#allocation8 + $0x7d0] sm:$0xf]  ;;  %v4162_v16 = vld [vmem:[#allocation8 + $0x594] sm:$0xf] }
 0x111   :  { %2380 = vmatpush.bf16.msra.mxu1 %v3331_v48  ;;  %2369 = vmatpush.bf16.msra.mxu0 %v3011_v52  ;;  %v3111_v48 = vor.u32 %v4034_v49, %v3108_v39  ;;  %v4106_v52 = vld [vmem:[#allocation8 + $0x3d4] sm:$0xf]  ;;  %v3907_v60 = vor.u32 %v4238_v51, %v3906_v47  ;;  %v3778_v38 = vld [vmem:[#allocation8 + $0x6d0] sm:$0xf] }
 0x112   :  { %2343 = vmatpush.bf16.msrb.mxu2 %v3519_v57  ;;  %v3076_v57 = vld [vmem:[#allocation8 + $0x170] sm:$0xf0]  ;;  %v3399_v61 = vor.u32 %v4106_v52, %v3396_v54  ;;  %v4206_v39 = vld [vmem:[#allocation8 + $0x6ec] sm:$0xf0]  ;;  %v2951_v52 = vor.u32 %v3994_v53, %v2948_v42  ;;  %v3050_v53 = vld [vmem:[#allocation8 + $0x118] sm:$0xf] }
 0x113   :  { %v3779_v45 = vor.u32 %v4206_v39, %v3778_v38  ;;  %v3458_v47 = vld [vmem:[#allocation8 + $0x450] sm:$0xf]  ;;  %v3620_v17 = vld [vmem:[#allocation8 + $0x5b0] sm:$0xf0]  ;;  %v4023_v42 = vld [vmem:[#allocation8 + $0x134] sm:$0xf0] }
 0x114   :  { %2355 = vmatpush.bf16.msrb.mxu3 %v3807_v62  ;;  %v3586_v62 = vld [vmem:[#allocation8 + $0x550] sm:$0xf]  ;;  %v4234_v25 = vld [vmem:[#allocation8 + $0x7d4] sm:$0xf] }
 0x115   :  { %2381 = vmatpush.bf16.msra.mxu1 %v3299_v63  ;;  %2370 = vmatpush.bf16.msra.mxu0 %v2979_v1  ;;  %v4158_v63 = vld [vmem:[#allocation8 + $0x56c] sm:$0xf0]  ;;  %v3079_v1 = vor.u32 %v4026_v56, %v3076_v57  ;;  %v3236_v56 = vld [vmem:[#allocation8 + $0x2b0] sm:$0xf0] }
 0x116   :  { %2344 = vmatpush.bf16.msrb.mxu2 %v3487_v5  ;;  %v4018_v5 = vld [vmem:[#allocation8 + $0x114] sm:$0xf]  ;;  %v3587_v7 = vor.u32 %v4158_v63, %v3586_v62  ;;  %v3746_v51 = vld [vmem:[#allocation8 + $0x690] sm:$0xf] }
 0x117   :  { %v4198_v54 = vld [vmem:[#allocation8 + $0x6ac] sm:$0xf0]  ;;  %v3986_v57 = vld [vmem:[#allocation8 + $0x14] sm:$0xf] }
 0x118   :  { %2356 = vmatpush.bf16.msrb.mxu3 %v3775_v10  ;;  %v3554_v10 = vld [vmem:[#allocation8 + $0x510] sm:$0xf]  ;;  %v3747_v62 = vor.u32 %v4198_v54, %v3746_v51  ;;  %v3876_v39 = vld [vmem:[#allocation8 + $0x7b0] sm:$0xf0] }
 0x119   :  { %2382 = vmatpush.bf16.msra.mxu1 %v3267_v11  ;;  %2371 = vmatpush.bf16.msra.mxu0 %v2947_v14  ;;  %v4150_v11 = vld [vmem:[#allocation8 + $0x52c] sm:$0xf0]  ;;  %v3047_v14 = vor.u32 %v4018_v5, %v3044_v6  ;;  %v4218_v54 = vld [vmem:[#allocation8 + $0x754] sm:$0xf] }
 0x11a   :  { %2345 = vmatpush.bf16.msrb.mxu2 %v3455_v18  ;;  %v4010_v18 = vld [vmem:[#allocation8 + $0xd4] sm:$0xf]  ;;  %v3555_v20 = vor.u32 %v4150_v11, %v3554_v10  ;;  %v3714_v5 = vld [vmem:[#allocation8 + $0x650] sm:$0xf]  ;;  %v3114_v11 = vld [vmem:[#allocation8 + $0x198] sm:$0xf] }
 0x11b   :  { %v4190_v6 = vld [vmem:[#allocation8 + $0x66c] sm:$0xf0]  ;;  %v3115_v24 = vor.u32 %v4039_v13, %v3114_v11  ;;  %v4130_v11 = vld [vmem:[#allocation8 + $0x494] sm:$0xf] }
 0x11c   :  { %2357 = vmatpush.bf16.msrb.mxu3 %v3743_v26  ;;  %v3810_v26 = vld [vmem:[#allocation8 + $0x710] sm:$0xf]  ;;  %v3715_v15 = vor.u32 %v4190_v6, %v3714_v5  ;;  %v4087_v5 = vld [vmem:[#allocation8 + $0x334] sm:$0xf0]  ;;  %v3492_v13 = vld [vmem:[#allocation8 + $0x4b0] sm:$0xf0] }
 0x11d   :  { %2383 = vmatpush.bf16.msra.mxu1 %v3235_v27  ;;  %2372 = vmatpush.bf16.msra.mxu0 %v2915_v30  ;;  %v3015_v27 = vor.u32 %v4010_v18, %v3012_v19  ;;  %v4002_v30 = vld [vmem:[#allocation8 + $0x94] sm:$0xf]  ;;  %v3811_v34 = vor.u32 %v4214_v28, %v3810_v26  ;;  %v3682_v18 = vld [vmem:[#allocation8 + $0x610] sm:$0xf]  ;;  %v4111_v28 = vld [vmem:[#allocation8 + $0x3f4] sm:$0xf0] }
 0x11e   :  { %2346 = vmatpush.bf16.msrb.mxu2 %v3423_v35  ;;  %v3303_v35 = vor.u32 %v4082_v44, %v3300_v29  ;;  %v2983_v49 = vor.u32 %v4002_v30, %v2980_v31  ;;  %v3908_v26 = vld [vmem:[#allocation8 + $0x7f0] sm:$0xf0]  ;;  %v3082_v44 = vld [vmem:[#allocation8 + $0x158] sm:$0xf]  ;;  %v3623_v30 = vor.u32 %v4162_v16, %v3620_v17 }
 0x11f   :  { %v4031_v29 = vld [vmem:[#allocation8 + $0x174] sm:$0xf0]  ;;  %v4202_v17 = vld [vmem:[#allocation8 + $0x6d4] sm:$0xf] }
 0x120   :  { %2358 = vmatpush.bf16.msrb.mxu3 %v3711_v40  ;;  %2373 = vmatmul.bf16.vlgmr.msra.gmra.mxu0 %v4505_v12  ;;  %v4074_v40 = vld [vmem:[#allocation8 + $0x2d4] sm:$0xf]  ;;  %v3083_v38 = vor.u32 %v4031_v29, %v3082_v44  ;;  %v2986_v6 = vld [vmem:[#allocation8 + $0x98] sm:$0xf] }
 0x121   :  { %2417 = vmatpush.bf16.msrb.mxu0 %v3143_v36  ;;  %2384 = vmatpush.bf16.msra.mxu1 %v3203_v41  ;;  %v3490_v36 = vld [vmem:[#allocation8 + $0x490] sm:$0xf]  ;;  %v3268_v41 = vld [vmem:[#allocation8 + $0x2f0] sm:$0xf0] }
 0x122   :  { %2391 = vmatpush.bf16.msra.mxu2 %v3651_v37  ;;  %v4134_v37 = vld [vmem:[#allocation8 + $0x4ac] sm:$0xf0]  ;;  %v3271_v46 = vor.u32 %v4074_v40, %v3268_v41  ;;  %v3370_v40 = vld [vmem:[#allocation8 + $0x398] sm:$0xf]  ;;  %v4194_v29 = vld [vmem:[#allocation8 + $0x694] sm:$0xf] }
 0x123   :  { %2347 = vmatmul.bf16.vlgmr.msrb.gmra.mxu2 %v4515_v21  ;;  %v3491_v43 = vor.u32 %v4134_v37, %v3490_v36  ;;  %v3588_v36 = vld [vmem:[#allocation8 + $0x570] sm:$0xf0]  ;;  %v4103_v41 = vld [vmem:[#allocation8 + $0x3b4] sm:$0xf0] }
 0x124   :  { %2359 = vmatpush.bf16.msrb.mxu3 %v3679_v58  ;;  %v2916_v58 = vld [vmem:[#allocation8 + $0x30] sm:$0xf0]  ;;  %v3371_v51 = vor.u32 %v4103_v41, %v3370_v40 }
 0x125   :  { %2418 = vmatpush.bf16.msrb.mxu0 %v3111_v48  ;;  %2385 = vmatpush.bf16.msra.mxu1 %v3171_v59  ;;  %v4126_v48 = vld [vmem:[#allocation8 + $0x46c] sm:$0xf0]  ;;  %v2919_v3 = vor.u32 %v3986_v57, %v2916_v58  ;;  %v4095_v57 = vld [vmem:[#allocation8 + $0x374] sm:$0xf0]  ;;  %v4114_v40 = vld [vmem:[#allocation8 + $0x414] sm:$0xf] }
 0x126   :  { %2392 = vmatpush.bf16.msra.mxu2 %v3619_v55  ;;  %v4066_v55 = vld [vmem:[#allocation8 + $0x294] sm:$0xf]  ;;  %v3459_v59 = vor.u32 %v4126_v48, %v3458_v47  ;;  %v3018_v58 = vld [vmem:[#allocation8 + $0xd8] sm:$0xf] }
 0x127   :  { %2360 = vmatmul.bf16.vlgmr.msrb.gmra.mxu3 %v4519_v50  ;;  %v3239_v63 = vor.u32 %v4066_v55, %v3236_v56  ;;  %v3556_v47 = vld [vmem:[#allocation8 + $0x530] sm:$0xf0]  ;;  %v3338_v56 = vld [vmem:[#allocation8 + $0x358] sm:$0xf] }
 0x128   :  { %2404 = vmatpush.bf16.msra.mxu3 %v3907_v60  ;;  %2386 = vmatmul.bf16.vlgmr.msra.gmra.mxu1 %v4508_v33  ;;  %v3146_v60 = vld [vmem:[#allocation8 + $0x1d8] sm:$0xf]  ;;  %v3844_v55 = vld [vmem:[#allocation8 + $0x770] sm:$0xf0] }
 0x129   :  { %2430 = vmatpush.bf16.msrb.mxu1 %v3399_v61  ;;  %2419 = vmatpush.bf16.msrb.mxu0 %v3079_v1  ;;  %v4047_v61 = vld [vmem:[#allocation8 + $0x1f4] sm:$0xf0]  ;;  %v4118_v1 = vld [vmem:[#allocation8 + $0x42c] sm:$0xf0]  ;;  %v3428_v41 = vld [vmem:[#allocation8 + $0x430] sm:$0xf0] }
 0x12a   :  { %2393 = vmatpush.bf16.msra.mxu2 %v3587_v7  ;;  %v3147_v7 = vor.u32 %v4047_v61, %v3146_v60  ;;  %v3427_v10 = vor.u32 %v4118_v1, %v3426_v0  ;;  %v3847_v61 = vor.u32 %v4218_v54, %v3844_v55  ;;  %v3339_v0 = vor.u32 %v4095_v57, %v3338_v56  ;;  %v3210_v54 = vld [vmem:[#allocation8 + $0x258] sm:$0xf]  ;;  %v4035_v57 = vld [vmem:[#allocation8 + $0x19c] sm:$0xf] }
 0x12b   :  { %v4063_v55 = vld [vmem:[#allocation8 + $0x274] sm:$0xf0]  ;;  %v3431_v56 = vor.u32 %v4114_v40, %v3428_v41  ;;  %v4011_v40 = vld [vmem:[#allocation8 + $0xdc] sm:$0xf] }
 0x12c   :  { %2405 = vmatpush.bf16.msra.mxu3 %v3875_v8  ;;  %v4058_v8 = vld [vmem:[#allocation8 + $0x254] sm:$0xf]  ;;  %v3020_v41 = vld [vmem:[#allocation8 + $0xf8] sm:$0xf0] }
 0x12d   :  { %2431 = vmatpush.bf16.msrb.mxu1 %v3367_v9  ;;  %2420 = vmatpush.bf16.msrb.mxu0 %v3047_v14  ;;  %v3204_v9 = vld [vmem:[#allocation8 + $0x270] sm:$0xf0]  ;;  %v3655_v14 = vor.u32 %v4170_v2, %v3652_v4  ;;  %v3306_v4 = vld [vmem:[#allocation8 + $0x318] sm:$0xf] }
 0x12e   :  { %2394 = vmatpush.bf16.msra.mxu2 %v3555_v20  ;;  %v3207_v19 = vor.u32 %v4058_v8, %v3204_v9  ;;  %v4182_v20 = vld [vmem:[#allocation8 + $0x62c] sm:$0xf0]  ;;  %v4210_v2 = vld [vmem:[#allocation8 + $0x714] sm:$0xf] }
 0x12f   :  { %v3683_v31 = vor.u32 %v4182_v20, %v3682_v18  ;;  %v3780_v18 = vld [vmem:[#allocation8 + $0x6f0] sm:$0xf0]  ;;  %v4079_v20 = vld [vmem:[#allocation8 + $0x2f4] sm:$0xf0] }
 0x130   :  { %2406 = vmatpush.bf16.msra.mxu3 %v3843_v22  ;;  %v4050_v22 = vld [vmem:[#allocation8 + $0x214] sm:$0xf] }
 0x131   :  { %2432 = vmatpush.bf16.msrb.mxu1 %v3335_v23  ;;  %2421 = vmatpush.bf16.msrb.mxu0 %v3015_v27  ;;  %v3172_v23 = vld [vmem:[#allocation8 + $0x230] sm:$0xf0]  ;;  %v3402_v27 = vld [vmem:[#allocation8 + $0x3d8] sm:$0xf] }
 0x132   :  { %2395 = vmatpush.bf16.msra.mxu2 %v3523_v32  ;;  %v3175_v32 = vor.u32 %v4050_v22, %v3172_v23  ;;  %v3403_v37 = vor.u32 %v4111_v28, %v3402_v27  ;;  %v2954_v22 = vld [vmem:[#allocation8 + $0x58] sm:$0xf]  ;;  %v3460_v27 = vld [vmem:[#allocation8 + $0x470] sm:$0xf0] }
 0x133   :  { %v3999_v23 = vld [vmem:[#allocation8 + $0x74] sm:$0xf0] }
 0x134   :  { %2407 = vmatpush.bf16.msra.mxu3 %v3811_v34  ;;  %v3911_v34 = vor.u32 %v4234_v25, %v3908_v26  ;;  %v3783_v25 = vor.u32 %v4202_v17, %v3780_v18  ;;  %v4122_v26 = vld [vmem:[#allocation8 + $0x454] sm:$0xf]  ;;  %v2955_v44 = vor.u32 %v3999_v23, %v2954_v22 }
 0x135   :  { %2433 = vmatpush.bf16.msrb.mxu1 %v3303_v35  ;;  %2422 = vmatpush.bf16.msrb.mxu0 %v2983_v49  ;;  %v4154_v35 = vld [vmem:[#allocation8 + $0x554] sm:$0xf] }
 0x136   :  { %2396 = vmatpush.bf16.msra.mxu2 %v3491_v43  ;;  %v4226_v49 = vld [vmem:[#allocation8 + $0x794] sm:$0xf]  ;;  %v3591_v43 = vor.u32 %v4154_v35, %v3588_v36  ;;  %v3991_v35 = vld [vmem:[#allocation8 + $0x34] sm:$0xf0]  ;;  %v3463_v36 = vor.u32 %v4122_v26, %v3460_v27  ;;  %v4099_v26 = vld [vmem:[#allocation8 + $0x39c] sm:$0xf] }
 0x137   :  { %v3372_v27 = vld [vmem:[#allocation8 + $0x3b8] sm:$0xf0] }
 0x138   :  { %2408 = vmatpush.bf16.msra.mxu3 %v3779_v45  ;;  %v3879_v45 = vor.u32 %v4226_v49, %v3876_v39 }
 0x139   :  { %2434 = vmatpush.bf16.msrb.mxu1 %v3271_v46  ;;  %2423 = vmatpush.bf16.msrb.mxu0 %v2951_v52  ;;  %v4146_v46 = vld [vmem:[#allocation8 + $0x514] sm:$0xf]  ;;  %v3051_v52 = vor.u32 %v4023_v42, %v3050_v53  ;;  %v3658_v53 = vld [vmem:[#allocation8 + $0x5d8] sm:$0xf] }
 0x13a   :  { %2397 = vmatpush.bf16.msra.mxu2 %v3459_v59  ;;  %v4015_v59 = vld [vmem:[#allocation8 + $0xf4] sm:$0xf0]  ;;  %v3559_v60 = vor.u32 %v4146_v46, %v3556_v47  ;;  %v4186_v47 = vld [vmem:[#allocation8 + $0x654] sm:$0xf] }
 0x13b   :  { %v3019_v1 = vor.u32 %v4015_v59, %v3018_v58  ;;  %v4175_v46 = vld [vmem:[#allocation8 + $0x5f4] sm:$0xf0]  ;;  %v3116_v58 = vld [vmem:[#allocation8 + $0x1b8] sm:$0xf0] }
 0x13c   :  { %2409 = vmatpush.bf16.msra.mxu3 %v3747_v62  ;;  %v4535_v48 = vpop.f32.mrf.mxu0  ;;  %v4138_v62 = vld [vmem:[#allocation8 + $0x4d4] sm:$0xf]  ;;  %v3659_v59 = vor.u32 %v4175_v46, %v3658_v53 }
 0x13d   :  { %2435 = vmatpush.bf16.msrb.mxu1 %v3239_v63  ;;  %2424 = vmatpush.bf16.msrb.mxu0 %v2919_v3  ;;  %v3524_v63 = vld [vmem:[#allocation8 + $0x4f0] sm:$0xf0] }
 0x13e   :  { %2398 = vmatpush.bf16.msra.mxu2 %v3427_v10  ;;  %v3812_v3 = vld [vmem:[#allocation8 + $0x730] sm:$0xf0]  ;;  %v3527_v8 = vor.u32 %v4138_v62, %v3524_v63  ;;  %v4167_v62 = vld [vmem:[#allocation8 + $0x5b4] sm:$0xf0] }
 0x13f   :  { %v3815_v10 = vor.u32 %v4210_v2, %v3812_v3  ;;  %v4178_v63 = vld [vmem:[#allocation8 + $0x614] sm:$0xf]  ;;  %v3178_v2 = vld [vmem:[#allocation8 + $0x218] sm:$0xf] }
 0x140   :  { %2410 = vmatpush.bf16.msra.mxu3 %v3715_v15  ;;  %2425 = vmatmul.bf16.vlgmr.msrb.gmra.mxu0 %v4505_v12  ;;  %v3307_v15 = vor.u32 %v4087_v5, %v3306_v4  ;;  %v4055_v3 = vld [vmem:[#allocation8 + $0x234] sm:$0xf0]  ;;  %v3119_v4 = vor.u32 %v4035_v57, %v3116_v58  ;;  %v4083_v58 = vld [vmem:[#allocation8 + $0x31c] sm:$0xf] }
 0x141   :  { %2469 = vmatpush.bf16.msra.mxu0 %v3147_v7  ;;  %2436 = vmatpush.bf16.msrb.mxu1 %v3207_v19  ;;  %v4007_v7 = vld [vmem:[#allocation8 + $0xb4] sm:$0xf0]  ;;  %v3179_v17 = vor.u32 %v4055_v3, %v3178_v2 }
 0x142   :  { %2443 = vmatpush.bf16.msrb.mxu2 %v3655_v14  ;;  %v2987_v16 = vor.u32 %v4007_v7, %v2986_v6  ;;  %v3274_v19 = vld [vmem:[#allocation8 + $0x2d8] sm:$0xf]  ;;  %v4107_v7 = vld [vmem:[#allocation8 + $0x3dc] sm:$0xf] }
 0x143   :  { %2399 = vmatmul.bf16.vlgmr.msra.gmra.mxu2 %v4515_v21  ;;  %v3275_v28 = vor.u32 %v4079_v20, %v3274_v19  ;;  %v3914_v5 = vld [vmem:[#allocation8 + $0x7d8] sm:$0xf] }
 0x144   :  { %2411 = vmatpush.bf16.msra.mxu3 %v3683_v31  ;;  %v4539_v9 = vpop.f32.mrf.mxu1  ;;  %v2168_v14 = vpop.f32.mrf.mxu0  ;;  %v3242_v31 = vld [vmem:[#allocation8 + $0x298] sm:$0xf] }
 0x145   :  { %2470 = vmatpush.bf16.msra.mxu0 %v3115_v24  ;;  %2437 = vmatpush.bf16.msrb.mxu1 %v3175_v32  ;;  %v3495_v24 = vor.u32 %v4130_v11, %v3492_v13  ;;  %v4071_v32 = vld [vmem:[#allocation8 + $0x2b4] sm:$0xf0]  ;;  %v3084_v11 = vld [vmem:[#allocation8 + $0x178] sm:$0xf0] }
 0x146   :  { %2444 = vmatpush.bf16.msrb.mxu2 %v3623_v30  ;;  %v3748_v30 = vld [vmem:[#allocation8 + $0x6b0] sm:$0xf0]  ;;  %v4239_v6 = vld [vmem:[#allocation8 + $0x7f4] sm:$0xf0] }
 0x147   :  { %2412 = vmatmul.bf16.vlgmr.msra.gmra.mxu3 %v4519_v50  ;;  %v3751_v39 = vor.u32 %v4194_v29, %v3748_v30  ;;  %v3915_v18 = vor.u32 %v4239_v6, %v3914_v5  ;;  %v3594_v19 = vld [vmem:[#allocation8 + $0x558] sm:$0xf]  ;;  %v4547_v30 = vld [vmem:[#allocation10] sm:$0xff] }
 0x148   :  { %2456 = vmatpush.bf16.msrb.mxu3 %v3911_v34  ;;  %2438 = vmatmul.bf16.vlgmr.msrb.gmra.mxu1 %v4508_v33  ;;  %v2922_v34 = vld [vmem:[#allocation8 + $0x18] sm:$0xf]  ;;  %v861_v53 = vperm.slane %v4547_v30, 0 }
 0x149   :  { %2482 = vmatpush.bf16.msra.mxu1 %v3403_v37  ;;  %2471 = vmatpush.bf16.msra.mxu0 %v3083_v38  ;;  %v4043_v37 = vld [vmem:[#allocation8 + $0x1dc] sm:$0xf]  ;;  %v4159_v20 = vld [vmem:[#allocation8 + $0x574] sm:$0xf0] }
 0x14a   :  { %2445 = vmatpush.bf16.msrb.mxu2 %v3591_v43  ;;  %v3148_v38 = vld [vmem:[#allocation8 + $0x1f8] sm:$0xf0]  ;;  %v3243_v43 = vor.u32 %v4071_v32, %v3242_v31  ;;  %v3595_v29 = vor.u32 %v4159_v20, %v3594_v19  ;;  %v3562_v32 = vld [vmem:[#allocation8 + $0x518] sm:$0xf] }
 0x14b   :  { %v4215_v57 = vld [vmem:[#allocation8 + $0x734] sm:$0xf0] }
 0x14c   :  { %2457 = vmatpush.bf16.msrb.mxu3 %v3879_v45  ;;  %v2181_v49 = vpop.f32.mrf.mxu1  ;;  %v4541_v42 = vpop.f32.mrf.mxu0  ;;  %v2923_v45 = vor.u32 %v3991_v35, %v2922_v34  ;;  %v4151_v34 = vld [vmem:[#allocation8 + $0x534] sm:$0xf0]  ;;  %v3375_v35 = vor.u32 %v4099_v26, %v3372_v27  ;;  %v4067_v27 = vld [vmem:[#allocation8 + $0x29c] sm:$0xf] }
 0x14d   :  { %2483 = vmatpush.bf16.msra.mxu1 %v3371_v51  ;;  %2472 = vmatpush.bf16.msra.mxu0 %v3051_v52  ;;  %v3716_v51 = vld [vmem:[#allocation8 + $0x670] sm:$0xf0]  ;;  %v3151_v52 = vor.u32 %v4043_v37, %v3148_v38  ;;  %v3850_v37 = vld [vmem:[#allocation8 + $0x758] sm:$0xf]  ;;  %v4091_v49 = vld [vmem:[#allocation8 + $0x35c] sm:$0xf] }
 0x14e   :  { %2446 = vmatpush.bf16.msrb.mxu2 %v3559_v60  ;;  %v3719_v60 = vor.u32 %v4186_v47, %v3716_v51  ;;  %v4223_v38 = vld [vmem:[#allocation8 + $0x774] sm:$0xf0] }
 0x14f   :  { %v3851_v47 = vor.u32 %v4223_v38, %v3850_v37  ;;  %v3530_v51 = vld [vmem:[#allocation8 + $0x4d8] sm:$0xf]  ;;  %v4171_v38 = vld [vmem:[#allocation8 + $0x5dc] sm:$0xf] }
 0x150   :  { %2458 = vmatpush.bf16.msrb.mxu3 %v3847_v61  ;;  %v3626_v61 = vld [vmem:[#allocation8 + $0x598] sm:$0xf] }
 0x151   :  { %2484 = vmatpush.bf16.msra.mxu1 %v3339_v0  ;;  %2473 = vmatpush.bf16.msra.mxu0 %v3019_v1  ;;  %v3211_v0 = vor.u32 %v4063_v55, %v3210_v54  ;;  %v3684_v1 = vld [vmem:[#allocation8 + $0x630] sm:$0xf0]  ;;  %v3627_v14 = vor.u32 %v4167_v62, %v3626_v61  ;;  %v3023_v55 = vor.u32 %v4011_v40, %v3020_v41  ;;  %v2988_v61 = vld [vmem:[#allocation8 + $0xb8] sm:$0xf0]  ;;  %v3498_v2 = vld [vmem:[#allocation8 + $0x498] sm:$0xf] }
 0x152   :  { %2447 = vmatpush.bf16.msrb.mxu2 %v3527_v8  ;;  %v3404_v8 = vld [vmem:[#allocation8 + $0x3f8] sm:$0xf0]  ;;  %v2167_v62 = vadd.f32 %v4535_v48, %v861_v53  ;;  %v4135_v3 = vld [vmem:[#allocation8 + $0x4b4] sm:$0xf0] }
 0x153   :  { %v3407_v22 = vor.u32 %v4107_v7, %v3404_v8  ;;  %v3786_v6 = vld [vmem:[#allocation8 + $0x6d8] sm:$0xf]  ;;  %v4075_v8 = vld [vmem:[#allocation8 + $0x2dc] sm:$0xf] }
 0x154   :  { %2459 = vmatpush.bf16.msrb.mxu3 %v3815_v10  ;;  %v4027_v10 = vld [vmem:[#allocation8 + $0x15c] sm:$0xf]  ;;  %v4543_v13 = vpop.f32.mrf.mxu1  ;;  %v4207_v7 = vld [vmem:[#allocation8 + $0x6f4] sm:$0xf0] }
 0x155   :  { %2485 = vmatpush.bf16.msra.mxu1 %v3307_v15  ;;  %2474 = vmatpush.bf16.msra.mxu0 %v2987_v16  ;;  %v3687_v15 = vor.u32 %v4178_v63, %v3684_v1  ;;  %v2220_v16 = vpop.f32.mrf.mxu0  ;;  %v3087_v23 = vor.u32 %v4027_v10, %v3084_v11  ;;  %v3276_v10 = vld [vmem:[#allocation8 + $0x2f8] sm:$0xf0]  ;;  %v3466_v19 = vld [vmem:[#allocation8 + $0x458] sm:$0xf] }
 0x156   :  { %2448 = vmatpush.bf16.msrb.mxu2 %v3495_v24  ;;  %v3882_v24 = vld [vmem:[#allocation8 + $0x798] sm:$0xf]  ;;  %v3995_v11 = vld [vmem:[#allocation8 + $0x5c] sm:$0xf]  ;;  %v3499_v16 = vor.u32 %v4135_v3, %v3498_v2 }
 0x157   :  { %v4127_v20 = vld [vmem:[#allocation8 + $0x474] sm:$0xf0]  ;;  %v4235_v2 = vld [vmem:[#allocation8 + $0x7dc] sm:$0xf] }
 0x158   :  { %2460 = vmatpush.bf16.msrb.mxu3 %v3783_v25  ;;  %v4231_v25 = vld [vmem:[#allocation8 + $0x7b4] sm:$0xf0]  ;;  %v3916_v3 = vld [vmem:[#allocation8 + $0x7f8] sm:$0xf0] }
 0x159   :  { %2486 = vmatpush.bf16.msra.mxu1 %v3275_v28  ;;  %2475 = vmatpush.bf16.msra.mxu0 %v2955_v44  ;;  %v4019_v28 = vld [vmem:[#allocation8 + $0x11c] sm:$0xf]  ;;  %v3883_v31 = vor.u32 %v4231_v25, %v3882_v24  ;;  %v3754_v25 = vld [vmem:[#allocation8 + $0x698] sm:$0xf] }
 0x15a   :  { %2449 = vmatpush.bf16.msrb.mxu2 %v3463_v36  ;;  %v3052_v44 = vld [vmem:[#allocation8 + $0x138] sm:$0xf0]  ;;  %v4199_v26 = vld [vmem:[#allocation8 + $0x6b4] sm:$0xf0] }
 0x15b   :  { %v3055_v36 = vor.u32 %v4019_v28, %v3052_v44  ;;  %v3244_v44 = vld [vmem:[#allocation8 + $0x2b8] sm:$0xf0]  ;;  %v4119_v37 = vld [vmem:[#allocation8 + $0x434] sm:$0xf0] }
 0x15c   :  { %2461 = vmatpush.bf16.msrb.mxu3 %v3751_v39  ;;  %v3340_v39 = vld [vmem:[#allocation8 + $0x378] sm:$0xf0]  ;;  %v3247_v40 = vor.u32 %v4067_v27, %v3244_v44  ;;  %v3722_v53 = vld [vmem:[#allocation8 + $0x658] sm:$0xf] }
 0x15d   :  { %2487 = vmatpush.bf16.msra.mxu1 %v3243_v43  ;;  %2476 = vmatpush.bf16.msra.mxu0 %v2923_v45  ;;  %v2233_v43 = vpop.f32.mrf.mxu1  ;;  %v3563_v45 = vor.u32 %v4151_v34, %v3562_v32  ;;  %v4552_v46 = vpop.f32.mrf.mxu0  ;;  %v3343_v54 = vor.u32 %v4091_v49, %v3340_v39  ;;  %v3467_v34 = vor.u32 %v4127_v20, %v3466_v19  ;;  %v3660_v49 = vld [vmem:[#allocation8 + $0x5f8] sm:$0xf0] }
 0x15e   :  { %2450 = vmatpush.bf16.msrb.mxu2 %v3431_v56  ;;  %v3818_v56 = vld [vmem:[#allocation8 + $0x718] sm:$0xf] }
 0x15f   :  { %v3819_v1 = vor.u32 %v4215_v57, %v3818_v56  ;;  %v4191_v43 = vld [vmem:[#allocation8 + $0x674] sm:$0xf0]  ;;  %v3663_v56 = vor.u32 %v4171_v38, %v3660_v49  ;;  %v4131_v49 = vld [vmem:[#allocation8 + $0x49c] sm:$0xf] }
 0x160   :  { %2462 = vmatpush.bf16.msrb.mxu3 %v3719_v60  ;;  %2477 = vmatmul.bf16.vlgmr.msra.gmra.mxu0 %v4505_v12  ;;  %v4003_v60 = vld [vmem:[#allocation8 + $0x9c] sm:$0xf]  ;;  %v3723_v57 = vor.u32 %v4191_v43, %v3722_v53 }
 0x161   :  { %2521 = vmatpush.bf16.msrb.mxu0 %v3151_v52  ;;  %2488 = vmatpush.bf16.msra.mxu1 %v3211_v0  ;;  %v4143_v52 = vld [vmem:[#allocation8 + $0x4f4] sm:$0xf0]  ;;  %v2991_v5 = vor.u32 %v4003_v60, %v2988_v61  ;;  %v4203_v53 = vld [vmem:[#allocation8 + $0x6dc] sm:$0xf] }
 0x162   :  { %2495 = vmatpush.bf16.msra.mxu2 %v3659_v59  ;;  %v3308_v59 = vld [vmem:[#allocation8 + $0x338] sm:$0xf0]  ;;  %v2192_v63 = vpop.f32.mrf.mxu2  ;;  %v3531_v0 = vor.u32 %v4143_v52, %v3530_v51  ;;  %v3690_v61 = vld [vmem:[#allocation8 + $0x618] sm:$0xf] }
 0x163   :  { %2451 = vmatmul.bf16.vlgmr.msrb.gmra.mxu2 %v4515_v21  ;;  %v3788_v43 = vld [vmem:[#allocation8 + $0x6f8] sm:$0xf0] }
 0x164   :  { %2463 = vmatpush.bf16.msrb.mxu3 %v3687_v15  ;;  %v2180_v15 = vadd.f32 %v4539_v9, %v2167_v62  ;;  %v3987_v9 = vld [vmem:[#allocation8 + $0x1c] sm:$0xf]  ;;  %v4183_v62 = vld [vmem:[#allocation8 + $0x634] sm:$0xf0] }
 0x165   :  { %2522 = vmatpush.bf16.msrb.mxu0 %v3119_v4  ;;  %2489 = vmatpush.bf16.msra.mxu1 %v3179_v17  ;;  %v3311_v4 = vor.u32 %v4083_v58, %v3308_v59  ;;  %v2272_v17 = vpop.f32.mrf.mxu0  ;;  %v4163_v58 = vld [vmem:[#allocation8 + $0x59c] sm:$0xf] }
 0x166   :  { %2496 = vmatpush.bf16.msra.mxu2 %v3627_v14  ;;  %v2956_v14 = vld [vmem:[#allocation8 + $0x78] sm:$0xf0] }
 0x167   :  { %2464 = vmatmul.bf16.vlgmr.msrb.gmra.mxu3 %v4519_v50  ;;  %v4556_v48 = vpop.f32.mrf.mxu1  ;;  %v2959_v24 = vor.u32 %v3995_v11, %v2956_v14  ;;  %v3628_v59 = vld [vmem:[#allocation8 + $0x5b8] sm:$0xf0] }
 0x168   :  { %2508 = vmatpush.bf16.msra.mxu3 %v3915_v18  ;;  %2490 = vmatmul.bf16.vlgmr.msra.gmra.mxu1 %v4508_v33  ;;  %v3787_v18 = vor.u32 %v4207_v7, %v3786_v6  ;;  %v3691_v6 = vor.u32 %v4183_v62, %v3690_v61  ;;  %v4155_v11 = vld [vmem:[#allocation8 + $0x55c] sm:$0xf] }
 0x169   :  { %2534 = vmatpush.bf16.msrb.mxu1 %v3407_v22  ;;  %2523 = vmatpush.bf16.msrb.mxu0 %v3087_v23  ;;  %v2193_v22 = vadd.f32 %v2192_v63, %v2180_v15  ;;  %v3279_v23 = vor.u32 %v4075_v8, %v3276_v10  ;;  %v4051_v63 = vld [vmem:[#allocation8 + $0x21c] sm:$0xf]  ;;  %v3919_v10 = vor.u32 %v4235_v2, %v3916_v3 }
 0x16a   :  { %2497 = vmatpush.bf16.msra.mxu2 %v3595_v29  ;;  %v2205_v28 = vpop.f32.mrf.mxu3  ;;  %v2924_v29 = vld [vmem:[#allocation8 + $0x38] sm:$0xf0]  ;;  %v2194_v32 = vpop.f32.mrf.mxu2 }
 0x16b   :  { %v2927_v41 = vor.u32 %v3987_v9, %v2924_v29  ;;  %v3596_v14 = vld [vmem:[#allocation8 + $0x578] sm:$0xf0] }
 0x16c   :  { %2509 = vmatpush.bf16.msra.mxu3 %v3883_v31  ;;  %v2206_v31 = vadd.f32 %v2205_v28, %v2193_v22  ;;  %v4227_v15 = vld [vmem:[#allocation8 + $0x79c] sm:$0xf]  ;;  %v3599_v20 = vor.u32 %v4155_v11, %v3596_v14 }
 0x16d   :  { %2535 = vmatpush.bf16.msrb.mxu1 %v3375_v35  ;;  %2524 = vmatpush.bf16.msrb.mxu0 %v3055_v36  ;;  %v3434_v35 = vld [vmem:[#allocation8 + $0x418] sm:$0xf]  ;;  %v3755_v36 = vor.u32 %v4199_v26, %v3754_v25  ;;  %v4219_v25 = vld [vmem:[#allocation8 + $0x75c] sm:$0xf] }
 0x16e   :  { %2498 = vmatpush.bf16.msra.mxu2 %v3563_v45  ;;  %v2573_v39 = vsub.f32 0.0, %v2206_v31  ;;  %v4059_v45 = vld [vmem:[#allocation8 + $0x25c] sm:$0xf] }
 0x16f   :  { %v2285_v52 = vpop.f32.mrf.mxu1  ;;  %v3852_v26 = vld [vmem:[#allocation8 + $0x778] sm:$0xf0] }
 0x170   :  { %2510 = vmatpush.bf16.msra.mxu3 %v3851_v47  ;;  %v3212_v47 = vld [vmem:[#allocation8 + $0x278] sm:$0xf0]  ;;  %v2581_v51 = vmul.f32 1.442695, %v2573_v39  ;;  %v3855_v9 = vor.u32 %v4219_v25, %v3852_v26  ;;  %v3791_v52 = vor.u32 %v4203_v53, %v3788_v43 }
 0x171   :  { %2536 = vmatpush.bf16.msrb.mxu1 %v3343_v54  ;;  %2525 = vmatpush.bf16.msrb.mxu0 %v3023_v55  ;;  %v3435_v54 = vor.u32 %v4119_v37, %v3434_v35  ;;  %v862_v55 = vperm.slane %v4547_v30, 1  ;;  %v3215_v60 = vor.u32 %v4059_v45, %v3212_v47  ;;  %v4139_v29 = vld [vmem:[#allocation8 + $0x4dc] sm:$0xf] }
 0x172   :  { %2499 = vmatpush.bf16.msra.mxu2 %v3531_v0  ;;  %4250 = vpow2.f32 %v2581_v51  ;;  %v2207_v0 = vpop.f32.mrf.mxu3  ;;  %v3532_v31 = vld [vmem:[#allocation8 + $0x4f8] sm:$0xf0] }
 0x173   :  { %v2219_v7 = vadd.f32 %v4541_v42, %v862_v55  ;;  %v3820_v35 = vld [vmem:[#allocation8 + $0x738] sm:$0xf0]  ;;  %v3535_v38 = vor.u32 %v4139_v29, %v3532_v31 }
 0x174   :  { %2511 = vmatpush.bf16.msra.mxu3 %v3819_v1  ;;  %v3180_v1 = vld [vmem:[#allocation8 + $0x238] sm:$0xf0] }
 0x175   :  { %2537 = vmatpush.bf16.msrb.mxu1 %v3311_v4  ;;  %2526 = vmatpush.bf16.msrb.mxu0 %v2991_v5  ;;  %v2244_v4 = vpop.f32.mrf.mxu2  ;;  %v3631_v5 = vor.u32 %v4163_v58, %v3628_v59  ;;  %v3183_v8 = vor.u32 %v4051_v63, %v3180_v1  ;;  %v3500_v39 = vld [vmem:[#allocation8 + $0x4b8] sm:$0xf0] }
 0x176   :  { %2500 = vmatpush.bf16.msra.mxu2 %v3499_v16  ;;  %v3884_v16 = vld [vmem:[#allocation8 + $0x7b8] sm:$0xf0]  ;;  %v3503_v51 = vor.u32 %v4131_v49, %v3500_v39 }
 0x177   :  { %v3887_v42 = vor.u32 %v4227_v15, %v3884_v16  ;;  %v3468_v55 = vld [vmem:[#allocation8 + $0x478] sm:$0xf0] }
 0x178   :  { %2512 = vmatpush.bf16.msra.mxu3 %v3787_v18  ;;  %v4251_v17 = vpop.eup %4250  ;;  %v2232_v18 = vadd.f32 %v4543_v13, %v2219_v7  ;;  %v4195_v58 = vld [vmem:[#allocation8 + $0x69c] sm:$0xf] }
 0x179   :  { %2538 = vmatpush.bf16.msrb.mxu1 %v3279_v23  ;;  %2527 = vmatpush.bf16.msrb.mxu0 %v2959_v24  ;;  %v2597_v19 = vadd.f32 1.0, %v4251_v17  ;;  %v3564_v23 = vld [vmem:[#allocation8 + $0x538] sm:$0xf0] }
 0x17a   :  { %2501 = vmatpush.bf16.msra.mxu2 %v3467_v34  ;;  %v2245_v22 = vadd.f32 %v2244_v4, %v2232_v18  ;;  %v2257_v24 = vpop.f32.mrf.mxu3  ;;  %v4211_v34 = vld [vmem:[#allocation8 + $0x71c] sm:$0xf] }
 0x17b   :  { %4252 = vrcp.f32 %v2597_v19  ;;  %v3756_v59 = vld [vmem:[#allocation8 + $0x6b8] sm:$0xf0] }
 0x17c   :  { %2513 = vmatpush.bf16.msra.mxu3 %v3755_v36  ;;  %v2258_v27 = vadd.f32 %v2257_v24, %v2245_v22  ;;  %v3759_v0 = vor.u32 %v4195_v58, %v3756_v59  ;;  %v4115_v1 = vld [vmem:[#allocation8 + $0x41c] sm:$0xf]  ;;  %v866_v59 = vperm.slane %v4547_v30, 5 }
 0x17d   :  { %2539 = vmatpush.bf16.msrb.mxu1 %v3247_v40  ;;  %2528 = vmatpush.bf16.msrb.mxu0 %v2927_v41  ;;  %v2246_v13 = vpop.f32.mrf.mxu2  ;;  %v863_v40 = vperm.slane %v4547_v30, 2  ;;  %v3436_v2 = vld [vmem:[#allocation8 + $0x438] sm:$0xf0] }
 0x17e   :  { %2502 = vmatpush.bf16.msra.mxu2 %v3435_v54  ;;  %v2574_v44 = vsub.f32 0.0, %v2258_v27  ;;  %v4123_v54 = vld [vmem:[#allocation8 + $0x45c] sm:$0xf] }
 0x17f   :  { %v4565_v32 = vpop.f32.mrf.mxu0  ;;  %v3471_v63 = vor.u32 %v4123_v54, %v3468_v55  ;;  %v4187_v4 = vld [vmem:[#allocation8 + $0x65c] sm:$0xf] }
 0x180   :  { %2514 = vmatpush.bf16.msra.mxu3 %v3723_v57  ;;  %2529 = vmatmul.bf16.vlgmr.msrb.gmra.mxu0 %v4505_v12  ;;  %v4147_v12 = vld [vmem:[#allocation8 + $0x51c] sm:$0xf]  ;;  %v2583_v36 = vmul.f32 1.442695, %v2574_v44 }
 0x181   :  { %2540 = vmatpush.bf16.msrb.mxu1 %v3215_v60  ;;  %2503 = vmatmul.bf16.vlgmr.msra.gmra.mxu2 %v4515_v21  ;;  %v3567_v28 = vor.u32 %v4147_v12, %v3564_v23  ;;  %v4253_v37 = vpop.eup %4252  ;;  %v4179_v14 = vld [vmem:[#allocation8 + $0x61c] sm:$0xf]  ;;  %v864_v12 = vperm.slane %v4547_v30, 3 }
 0x182   :  { %2547 = vmatpush.bf16.msrb.mxu2 %v3663_v56  ;;  %2613 = vst [vmem:[#allocation11] sm:$0xff] %v4253_v37  ;;  %4254 = vpow2.f32 %v2583_v36  ;;  %v2259_v41 = vpop.f32.mrf.mxu3  ;;  %v2271_v56 = vadd.f32 %v4552_v46, %v863_v40  ;;  %v3692_v15 = vld [vmem:[#allocation8 + $0x638] sm:$0xf0] }
 0x183   :  { %v3695_v18 = vor.u32 %v4179_v14, %v3692_v15  ;;  %v2323_v26 = vadd.f32 %v4565_v32, %v864_v12  ;;  %v867_v14 = vperm.slane %v4547_v30, 6 }
 0x184   :  { %2515 = vmatpush.bf16.msra.mxu3 %v3691_v6  ;;  %v2284_v61 = vadd.f32 %v4556_v48, %v2271_v56 }
 0x185   :  { %2541 = vmatpush.bf16.msrb.mxu1 %v3183_v8  ;;  %v2335_v45 = vpop.f32.mrf.mxu1  ;;  %v2296_v47 = vpop.f32.mrf.mxu2 }
 0x186   :  { %2548 = vmatpush.bf16.msrb.mxu2 %v3631_v5  ;;  %v2297_v3 = vadd.f32 %v2296_v47, %v2284_v61  ;;  %v3724_v5 = vld [vmem:[#allocation8 + $0x678] sm:$0xf0]  ;;  %v2336_v13 = vadd.f32 %v2335_v45, %v2323_v26 }
 0x187   :  { %2516 = vmatmul.bf16.vlgmr.msra.gmra.mxu3 %v4519_v50  ;;  %v2324_v57 = vpop.f32.mrf.mxu0  ;;  %v3727_v11 = vor.u32 %v4187_v4, %v3724_v5 }
 0x188   :  { %2560 = vmatpush.bf16.msrb.mxu3 %v3919_v10  ;;  %2542 = vmatmul.bf16.vlgmr.msrb.gmra.mxu1 %v4508_v33  ;;  %v3823_v33 = vor.u32 %v4211_v34, %v3820_v35  ;;  %v4255_v60 = vpop.eup %4254  ;;  %v3439_v10 = vor.u32 %v4115_v1, %v3436_v2 }
 0x189   :  { %v2598_v62 = vadd.f32 1.0, %v4255_v60 }
 0x18a   :  { %2549 = vmatpush.bf16.msrb.mxu2 %v3599_v20  ;;  %v2309_v6 = vpop.f32.mrf.mxu3 }
 0x18b   :  { %4256 = vrcp.f32 %v2598_v62  ;;  %v2310_v7 = vadd.f32 %v2309_v6, %v2297_v3 }
 0x18c   :  { %2561 = vmatpush.bf16.msrb.mxu3 %v3887_v42 }
 0x18d   :  { %v2337_v46 = vpop.f32.mrf.mxu1  ;;  %v2298_v8 = vpop.f32.mrf.mxu2  ;;  %v2575_v48 = vsub.f32 0.0, %v2310_v7 }
 0x18e   :  { %2550 = vmatpush.bf16.msrb.mxu2 %v3567_v28 }
 0x18f   :  { %v2585_v17 = vmul.f32 1.442695, %v2575_v48 }
 0x190   :  { %2562 = vmatpush.bf16.msrb.mxu3 %v3855_v9 }
 0x191   :  { %v4257_v16 = vpop.eup %4256  ;;  %4258 = vpow2.f32 %v2585_v17 }
 0x192   :  { %2551 = vmatpush.bf16.msrb.mxu2 %v3535_v38  ;;  %2614 = vst [vmem:[#allocation11 + $0x8] sm:$0xff] %v4257_v16  ;;  %v2311_v19 = vpop.f32.mrf.mxu3  ;;  %v865_v38 = vperm.slane %v4547_v30, 4 }
 0x194   :  { %2563 = vmatpush.bf16.msrb.mxu3 %v3823_v33 }
 0x196   :  { %2552 = vmatpush.bf16.msrb.mxu2 %v3503_v51 }
 0x197   :  { %v4259_v20 = vpop.eup %4258 }
 0x198   :  { %2564 = vmatpush.bf16.msrb.mxu3 %v3791_v52  ;;  %v2599_v22 = vadd.f32 1.0, %v4259_v20 }
 0x19a   :  { %2553 = vmatpush.bf16.msrb.mxu2 %v3471_v63  ;;  %4260 = vrcp.f32 %v2599_v22 }
 0x19c   :  { %2565 = vmatpush.bf16.msrb.mxu3 %v3759_v0 }
 0x19d   :  { %v2374_v42 = vpop.f32.mrf.mxu0 }
 0x19e   :  { %2554 = vmatpush.bf16.msrb.mxu2 %v3439_v10  ;;  %v2375_v32 = vadd.f32 %v2374_v42, %v865_v38 }
 0x1a0   :  { %2566 = vmatpush.bf16.msrb.mxu3 %v3727_v11  ;;  %v4261_v23 = vpop.eup %4260 }
 0x1a1   :  { %2555 = vmatmul.bf16.vlgmr.msrb.gmra.mxu2 %v4515_v21  ;;  %2615 = vst [vmem:[#allocation11 + $0x10] sm:$0xff] %v4261_v23 }
 0x1a4   :  { %2567 = vmatpush.bf16.msrb.mxu3 %v3695_v18 }
 0x1a5   :  { %v2387_v25 = vpop.f32.mrf.mxu1  ;;  %v2376_v27 = vpop.f32.mrf.mxu0 }
 0x1a6   :  { %v2348_v24 = vpop.f32.mrf.mxu2  ;;  %v2388_v41 = vadd.f32 %v2387_v25, %v2375_v32 }
 0x1a7   :  { %2568 = vmatmul.bf16.vlgmr.msrb.gmra.mxu3 %v4519_v50  ;;  %v2349_v28 = vadd.f32 %v2348_v24, %v2336_v13 }
 0x1aa   :  { %v2361_v21 = vpop.f32.mrf.mxu3 }
 0x1ab   :  { %v2362_v44 = vadd.f32 %v2361_v21, %v2349_v28  ;;  %v868_v21 = vperm.slane %v4547_v30, 7 }
 0x1ad   :  { %v2389_v29 = vpop.f32.mrf.mxu1  ;;  %v2576_v31 = vsub.f32 0.0, %v2362_v44 }
 0x1ae   :  { %v2350_v9 = vpop.f32.mrf.mxu2 }
 0x1af   :  { %v2587_v50 = vmul.f32 1.442695, %v2576_v31 }
 0x1b1   :  { %4262 = vpow2.f32 %v2587_v50 }
 0x1b2   :  { %v2363_v34 = vpop.f32.mrf.mxu3 }
 0x1b7   :  { %v4263_v35 = vpop.eup %4262 }
 0x1b8   :  { %v2600_v36 = vadd.f32 1.0, %v4263_v35 }
 0x1ba   :  { %4264 = vrcp.f32 %v2600_v36 }
 0x1bd   :  { %v2426_v37 = vpop.f32.mrf.mxu0 }
 0x1be   :  { %v2427_v61 = vadd.f32 %v2426_v37, %v866_v59 }
 0x1c0   :  { %v4265_v33 = vpop.eup %4264 }
 0x1c1   :  { %2616 = vst [vmem:[#allocation11 + $0x18] sm:$0xff] %v4265_v33 }
 0x1c5   :  { %v2439_v39 = vpop.f32.mrf.mxu1  ;;  %v2428_v40 = vpop.f32.mrf.mxu0 }
 0x1c6   :  { %v2400_v49 = vpop.f32.mrf.mxu2  ;;  %v2440_v1 = vadd.f32 %v2439_v39, %v2427_v61 }
 0x1c7   :  { %v2401_v53 = vadd.f32 %v2400_v49, %v2388_v41 }
 0x1ca   :  { %v2413_v43 = vpop.f32.mrf.mxu3 }
 0x1cb   :  { %v2414_v45 = vadd.f32 %v2413_v43, %v2401_v53 }
 0x1cd   :  { %v2577_v47 = vsub.f32 0.0, %v2414_v45  ;;  %v2441_v52 = vpop.f32.mrf.mxu1 }
 0x1ce   :  { %v2402_v51 = vpop.f32.mrf.mxu2 }
 0x1cf   :  { %v2589_v54 = vmul.f32 1.442695, %v2577_v47 }
 0x1d1   :  { %4266 = vpow2.f32 %v2589_v54 }
 0x1d2   :  { %v2415_v55 = vpop.f32.mrf.mxu3 }
 0x1d7   :  { %v4267_v56 = vpop.eup %4266 }
 0x1d8   :  { %v2601_v57 = vadd.f32 1.0, %v4267_v56 }
 0x1da   :  { %4268 = vrcp.f32 %v2601_v57 }
 0x1dd   :  { %v2478_v58 = vpop.f32.mrf.mxu0 }
 0x1de   :  { %v2479_v16 = vadd.f32 %v2478_v58, %v867_v14 }
 0x1e0   :  { %v4269_v60 = vpop.eup %4268 }
 0x1e1   :  { %2617 = vst [vmem:[#allocation11 + $0x20] sm:$0xff] %v4269_v60 }
 0x1e5   :  { %v2491_v63 = vpop.f32.mrf.mxu1  ;;  %v2480_v0 = vpop.f32.mrf.mxu0 }
 0x1e6   :  { %v2452_v62 = vpop.f32.mrf.mxu2  ;;  %v2492_v20 = vadd.f32 %v2491_v63, %v2479_v16 }
 0x1e7   :  { %v2453_v2 = vadd.f32 %v2452_v62, %v2440_v1 }
 0x1ea   :  { %v2465_v3 = vpop.f32.mrf.mxu3 }
 0x1eb   :  { %v2466_v4 = vadd.f32 %v2465_v3, %v2453_v2 }
 0x1ed   :  { %v2578_v5 = vsub.f32 0.0, %v2466_v4  ;;  %v2493_v7 = vpop.f32.mrf.mxu1 }
 0x1ee   :  { %v2454_v6 = vpop.f32.mrf.mxu2 }
 0x1ef   :  { %v2591_v46 = vmul.f32 1.442695, %v2578_v5 }
 0x1f1   :  { %4270 = vpow2.f32 %v2591_v46 }
 0x1f2   :  { %v2467_v8 = vpop.f32.mrf.mxu3 }
 0x1f7   :  { %v4271_v10 = vpop.eup %4270 }
 0x1f8   :  { %v2602_v11 = vadd.f32 1.0, %v4271_v10 }
 0x1fa   :  { %4272 = vrcp.f32 %v2602_v11 }
 0x1fd   :  { %v2530_v48 = vpop.f32.mrf.mxu0 }
 0x1fe   :  { %v2531_v9 = vadd.f32 %v2530_v48, %v868_v21 }
 0x200   :  { %v4273_v15 = vpop.eup %4272 }
 0x201   :  { %2618 = vst [vmem:[#allocation11 + $0x28] sm:$0xff] %v4273_v15 }
 0x204   :  { %v2504_v17 = vpop.f32.mrf.mxu2 }
 0x205   :  { %v2543_v18 = vpop.f32.mrf.mxu1  ;;  %v2532_v19 = vpop.f32.mrf.mxu0  ;;  %v2505_v22 = vadd.f32 %v2504_v17, %v2492_v20 }
 0x206   :  { %v2544_v31 = vadd.f32 %v2543_v18, %v2531_v9 }
 0x20a   :  { %v2517_v42 = vpop.f32.mrf.mxu3 }
 0x20b   :  { %v2518_v12 = vadd.f32 %v2517_v42, %v2505_v22 }
 0x20c   :  { %v2506_v24 = vpop.f32.mrf.mxu2 }
 0x20d   :  { %v2579_v23 = vsub.f32 0.0, %v2518_v12  ;;  %v2545_v25 = vpop.f32.mrf.mxu1 }
 0x20f   :  { %v2593_v26 = vmul.f32 1.442695, %v2579_v23 }
 0x211   :  { %4274 = vpow2.f32 %v2593_v26 }
 0x212   :  { %v2519_v27 = vpop.f32.mrf.mxu3 }
 0x217   :  { %v4275_v13 = vpop.eup %4274 }
 0x218   :  { %v2603_v28 = vadd.f32 1.0, %v4275_v13 }
 0x21a   :  { %4276 = vrcp.f32 %v2603_v28 }
 0x220   :  { %v4277_v44 = vpop.eup %4276 }
 0x221   :  { %2619 = vst [vmem:[#allocation11 + $0x30] sm:$0xff] %v4277_v44 }
 0x224   :  { %v2556_v29 = vpop.f32.mrf.mxu2 }
 0x225   :  { %v2557_v50 = vadd.f32 %v2556_v29, %v2544_v31 }
 0x22a   :  { %v2569_v34 = vpop.f32.mrf.mxu3 }
 0x22b   :  { %v2570_v35 = vadd.f32 %v2569_v34, %v2557_v50 }
 0x22c   :  { %v2558_v37 = vpop.f32.mrf.mxu2 }
 0x22d   :  { %v2580_v36 = vsub.f32 0.0, %v2570_v35 }
 0x22f   :  { %v2595_v38 = vmul.f32 1.442695, %v2580_v36 }
 0x231   :  { %4278 = vpow2.f32 %v2595_v38 }
 0x232   :  { %v2571_v33 = vpop.f32.mrf.mxu3 }
 0x237   :  { %v4279_v32 = vpop.eup %4278 }
 0x238   :  { %v2604_v49 = vadd.f32 1.0, %v4279_v32 }
 0x23a   :  { %4280 = vrcp.f32 %v2604_v49 }
 0x240   :  { %v4281_v30 = vpop.eup %4280 }
 0x241   :  { %2620 = vst [vmem:[#allocation11 + $0x38] sm:$0xff] %v4281_v30 }
 0x242   :  { %2631 = dma.vmem_to_hbm [thread:$0]  %s2627_s4, 1024, %s2629_s21, [#allocation4]  }
 0x243   :  { %4432 = dma.done.wait [#allocation4], 1024  }
 0x244   :  { %4433 = vsyncadd [#allocation4], 4294966272 }
 0x245   :  { %2636 = vsyncpa [#allocation3], 1 }
 0x246   :  { %2637 = vsyncpa [#allocation6], 1 }
 0x247   :  { %2638 = vsyncpa [#allocation9], 1 }
 0x248   :  { %2639 = vsyncpa [#allocation4], 1 }

</bundles_post_ra>
